<compile_context>
chip_gen: v7x
topology: tpu7x:2x2x1
jax: 0.10.0
libtpu: 0.0.40
codegen_flags: <defaults>
</compile_context>

<pallas_src>
import functools

import jax
import jax.numpy as jnp
from jax.experimental import pallas as pl
from jax.experimental.pallas import tpu as pltpu

C_IN = 9
C_OUT = 32
K = 3
H = 256  # dim_embedding_key


def _encoder_kernel(xcol_ref, wc_ref, bc_ref, wih_ref, whh_ref, bih_ref, bhh_ref,
                    h_ref, gi_ref, *, tc, bp, t_total):
    """One grid step = one chunk of `tc` GRU time steps.

    xcol_ref : (tc*bp, 27)  im2col'd conv input rows for this chunk (time-major, batch
                            padded to bp; row = t_local*bp + b)
    wc_ref   : (27, 32)     conv weight (flattened, matching im2col order)
    bc_ref   : (1, 32)      conv bias
    wih_ref  : (32, 768)    GRU input->gates weight (transposed PyTorch weight_ih_l0)
    whh_ref  : (256, 768)   GRU hidden->gates weight (transposed PyTorch weight_hh_l0)
    bih_ref  : (1, 768)     GRU input bias
    bhh_ref  : (1, 768)     GRU hidden bias
    h_ref    : (bp, 256)    output ref; resident hidden state across chunks
    gi_ref   : (tc*bp, 768) VMEM scratch for the precomputed input->gates activations
    """
    c = pl.program_id(0)

    @pl.when(c == 0)
    def _():
        h_ref[...] = jnp.zeros_like(h_ref)

    # ---- chunk prologue: conv (im2col matmul) + ReLU + input->gates GEMM, one pass ----
    cdt = wih_ref.dtype
    xcol = xcol_ref[...].astype(cdt)                                    # (tc*bp, 27)
    x_emb = jnp.maximum(
        jnp.dot(xcol, wc_ref[...], preferred_element_type=jnp.float32)
        + bc_ref[...].astype(jnp.float32), 0.0)                         # (tc*bp, 32)
    gi_ref[...] = (jnp.dot(x_emb.astype(cdt), wih_ref[...],
                           preferred_element_type=jnp.float32)
                   + bih_ref[...].astype(jnp.float32))                  # (tc*bp, 768)

    # ---- sequential recurrence: only h @ whh + gate math per step ----
    whh = whh_ref[...]
    bhh = bhh_ref[...].astype(jnp.float32)

    # number of valid timesteps in this (possibly partial, last) chunk
    n_valid = jnp.minimum(tc, t_total - c * tc)

    def step(t, h):
        row = pl.multiple_of(t * bp, bp)
        gi = gi_ref[pl.ds(row, bp), :]                                  # (bp, 768)
        gh = (jnp.dot(h.astype(whh.dtype), whh,
                      preferred_element_type=jnp.float32) + bhh)        # (bp, 768)
        r = jax.nn.sigmoid(gi[:, 0 * H:1 * H] + gh[:, 0 * H:1 * H])
        z = jax.nn.sigmoid(gi[:, 1 * H:2 * H] + gh[:, 1 * H:2 * H])
        n = jnp.tanh(gi[:, 2 * H:3 * H] + r * gh[:, 2 * H:3 * H])
        return (1.0 - z) * n + z * h

    h_ref[...] = jax.lax.fori_loop(0, n_valid, step, h_ref[...])


def intention_encoder_forward(X, params, *, t_chunk=64, use_bf16=False):
    """X: (B, T, 9) float32  ->  (B, 256) float32 (final GRU hidden state)."""
    B, T, Cin = X.shape
    assert Cin == C_IN

    # Pad batch to a full sublane height (multiple of 8) so vregs / MXU rows are filled.
    BP = max(8, ((B + 7) // 8) * 8)

    # --- glue: im2col for Conv1d(kernel=3, padding=1) over the time axis ---
    X_pad = jnp.pad(X, ((0, 0), (1, 1), (0, 0)))                        # (B, T+2, 9)
    xcol = jnp.concatenate([X_pad[:, k:k + T, :] for k in range(K)],
                           axis=-1)                                     # (B, T, 27)
    xcol = jnp.transpose(xcol, (1, 0, 2))                               # (T, B, 27)

    # Chunk the time axis; padded time rows feed unused gi rows only (loop skips them).
    TC = min(t_chunk, T)
    n_chunks = pl.cdiv(T, TC)
    Tp = n_chunks * TC
    xcol = jnp.pad(xcol, ((0, Tp - T), (0, BP - B), (0, 0)))            # (Tp, BP, 27)
    xcol_flat = xcol.reshape(Tp * BP, K * C_IN)                         # (Tp*BP, 27)

    cdt = jnp.bfloat16 if use_bf16 else jnp.float32
    wc = params["wc"].astype(cdt)
    wih = params["wih"].astype(cdt)
    whh = params["whh"].astype(cdt)
    bc, bih, bhh = params["bc"], params["bih"], params["bhh"]

    grid_spec = pltpu.PrefetchScalarGridSpec(
        num_scalar_prefetch=0,
        grid=(n_chunks,),
        in_specs=[
            pl.BlockSpec((TC * BP, K * C_IN), lambda c: (c, 0)),        # xcol chunk
            pl.BlockSpec((K * C_IN, C_OUT), lambda c: (0, 0)),          # wc
            pl.BlockSpec((1, C_OUT), lambda c: (0, 0)),                 # bc
            pl.BlockSpec((C_OUT, 3 * H), lambda c: (0, 0)),             # wih
            pl.BlockSpec((H, 3 * H), lambda c: (0, 0)),                 # whh
            pl.BlockSpec((1, 3 * H), lambda c: (0, 0)),                 # bih
            pl.BlockSpec((1, 3 * H), lambda c: (0, 0)),                 # bhh
        ],
        out_specs=pl.BlockSpec((BP, H), lambda c: (0, 0)),              # resident hidden
        scratch_shapes=[pltpu.VMEM((TC * BP, 3 * H), jnp.float32)],     # gi chunk
    )

    h = pl.pallas_call(
        functools.partial(_encoder_kernel, tc=TC, bp=BP, t_total=T),
        out_shape=jax.ShapeDtypeStruct((BP, H), jnp.float32),
        grid_spec=grid_spec,
        compiler_params=pltpu.CompilerParams(
            dimension_semantics=("arbitrary",)),    # hidden state carries across chunks
    )(xcol_flat, wc, bc, wih, whh, bih, bhh)

    return h[:B]


def init_params(key):
    """Deterministic, kaiming-normal-style init matching the PyTorch shapes."""
    k1, k2, k3 = jax.random.split(key, 3)

    # Conv1d weight: (C_out, C_in, K) in PyTorch; fan_in = C_in * K.
    w_conv = jax.random.normal(k1, (C_OUT, C_IN, K), jnp.float32) * jnp.sqrt(
        2.0 / (C_IN * K))
    # Flatten to (K*C_in, C_out) matching im2col order [k=0 all ci, k=1 all ci, k=2 ...].
    wc = jnp.transpose(w_conv, (2, 1, 0)).reshape(K * C_IN, C_OUT)
    bc = jnp.zeros((1, C_OUT), jnp.float32)

    # GRU weight_ih_l0: (3H, C_out), weight_hh_l0: (3H, H); kaiming fan_in = last dim.
    w_ih = jax.random.normal(k2, (3 * H, C_OUT), jnp.float32) * jnp.sqrt(2.0 / C_OUT)
    w_hh = jax.random.normal(k3, (3 * H, H), jnp.float32) * jnp.sqrt(2.0 / H)
    wih = w_ih.T                      # (C_out, 3H)
    whh = w_hh.T                      # (H, 3H)
    bih = jnp.zeros((1, 3 * H), jnp.float32)
    bhh = jnp.zeros((1, 3 * H), jnp.float32)

    return dict(wc=wc, bc=bc, wih=wih, whh=whh, bih=bih, bhh=bhh)


def _reference_forward(X, params):
    """Pure-JAX reference of the same forward (conv1d + relu + GRU final state)."""
    B, T, _ = X.shape
    X_pad = jnp.pad(X, ((0, 0), (1, 1), (0, 0)))
    xcol = jnp.concatenate([X_pad[:, k:k + T, :] for k in range(K)], axis=-1)
    x_emb = jnp.maximum(xcol @ params["wc"] + params["bc"], 0.0)        # (B, T, 32)

    def cell(h, x_t):
        gi = x_t @ params["wih"] + params["bih"]
        gh = h @ params["whh"] + params["bhh"]
        r = jax.nn.sigmoid(gi[:, :H] + gh[:, :H])
        z = jax.nn.sigmoid(gi[:, H:2 * H] + gh[:, H:2 * H])
        n = jnp.tanh(gi[:, 2 * H:] + r * gh[:, 2 * H:])
        h_new = (1.0 - z) * n + z * h
        return h_new, None

    h0 = jnp.zeros((B, H), jnp.float32)
    h_final, _ = jax.lax.scan(cell, h0, jnp.transpose(x_emb, (1, 0, 2)))
    return h_final


if __name__ == "__main__":
    key = jax.random.PRNGKey(0)
    pkey, xkey = jax.random.split(key)
    params = init_params(pkey)

    B, T = 2, 8
    X = jax.random.normal(xkey, (B, T, C_IN), jnp.float32)

    out = intention_encoder_forward(X, params)          # f32 path (bit-accurate check)
    out = jax.block_until_ready(out)

    ref = _reference_forward(X, params)
    assert out.shape == (B, H)
    assert jnp.allclose(out, ref, atol=1e-4, rtol=1e-4), "mismatch vs JAX reference"

    print("KERNEL_OK")
</pallas_src>

<mosaic_0001>
module attributes {stable_mosaic.version = 11 : i64} {
  func.func @_encoder_kernel(%arg0: i32, %arg1: memref<64x27xf32, #tpu.memory_space<vmem>>, %arg2: memref<27x32xf32, #tpu.memory_space<vmem>>, %arg3: memref<1x32xf32, #tpu.memory_space<vmem>>, %arg4: memref<32x768xf32, #tpu.memory_space<vmem>>, %arg5: memref<256x768xf32, #tpu.memory_space<vmem>>, %arg6: memref<1x768xf32, #tpu.memory_space<vmem>>, %arg7: memref<1x768xf32, #tpu.memory_space<vmem>>, %arg8: memref<8x256xf32, #tpu.memory_space<vmem>>, %arg9: memref<64x768xf32, #tpu.memory_space<vmem>>) attributes {dimension_semantics = [#tpu.dimension_semantics<arbitrary>], iteration_bounds = array<i64: 1>, scalar_prefetch = 0 : i64, scratch_operands = 1 : i64, tpu.core_type = #tpu.core_type<tc>, window_params = [{transform_indices = @transform_0, window_bounds = array<i64: 64, 27>}, {pipeline_mode = #tpu.pipeline_mode<synchronous>, transform_indices = @transform_1, window_bounds = array<i64: 27, 32>}, {pipeline_mode = #tpu.pipeline_mode<synchronous>, transform_indices = @transform_2, window_bounds = array<i64: 1, 32>}, {pipeline_mode = #tpu.pipeline_mode<synchronous>, transform_indices = @transform_3, window_bounds = array<i64: 32, 768>}, {pipeline_mode = #tpu.pipeline_mode<synchronous>, transform_indices = @transform_4, window_bounds = array<i64: 256, 768>}, {pipeline_mode = #tpu.pipeline_mode<synchronous>, transform_indices = @transform_5, window_bounds = array<i64: 1, 768>}, {pipeline_mode = #tpu.pipeline_mode<synchronous>, transform_indices = @transform_6, window_bounds = array<i64: 1, 768>}, {pipeline_mode = #tpu.pipeline_mode<synchronous>, transform_indices = @transform_7, window_bounds = array<i64: 8, 256>}]} {
    %c0_i32 = arith.constant 0 : i32
    %0 = arith.cmpi eq, %arg0, %c0_i32 : i32
    %1 = arith.extui %0 : i1 to i32
    %c0_i32_0 = arith.constant 0 : i32
    %2 = arith.cmpi ne, %1, %c0_i32_0 : i32
    scf.if %2 {
      %cst_25 = arith.constant 0.000000e+00 : f32
      %27 = vector.broadcast %cst_25 : f32 to vector<8x256xf32>
      %c0_26 = arith.constant 0 : index
      %c0_27 = arith.constant 0 : index
      %28 = vector.load %arg8[%c0_26, %c0_27] : memref<8x256xf32, #tpu.memory_space<vmem>>, vector<8x256xf32>
      tpu.vector_store %arg8[%c0_26, %c0_27], %27 {strides = array<i32>} : memref<8x256xf32, #tpu.memory_space<vmem>>, vector<8x256xf32>,
    } else {
    }
    %c0 = arith.constant 0 : index
    %c0_1 = arith.constant 0 : index
    %3 = vector.load %arg1[%c0, %c0_1] : memref<64x27xf32, #tpu.memory_space<vmem>>, vector<64x27xf32>
    %c0_2 = arith.constant 0 : index
    %c0_3 = arith.constant 0 : index
    %4 = vector.load %arg2[%c0_2, %c0_3] : memref<27x32xf32, #tpu.memory_space<vmem>>, vector<27x32xf32>
    %cst = arith.constant dense<0.000000e+00> : vector<64x32xf32>
    %5 = tpu.matmul %3, %4, %cst {dimension_numbers = #tpu.dot_dimension_numbers<[1], [0], [0], [1], [0, 0, 1, 1], [], []>} : vector<64x27xf32>, vector<27x32xf32>, vector<64x32xf32> -> vector<64x32xf32>
    %c0_4 = arith.constant 0 : index
    %c0_5 = arith.constant 0 : index
    %6 = vector.load %arg3[%c0_4, %c0_5] : memref<1x32xf32, #tpu.memory_space<vmem>>, vector<1x32xf32>
    %7 = vector.broadcast %6 : vector<1x32xf32> to vector<64x32xf32>
    %8 = arith.addf %5, %7 : vector<64x32xf32>
    %cst_6 = arith.constant 0.000000e+00 : f32
    %9 = vector.broadcast %cst_6 : f32 to vector<64x32xf32>
    %10 = arith.maximumf %8, %9 : vector<64x32xf32>
    %c0_7 = arith.constant 0 : index
    %c0_8 = arith.constant 0 : index
    %11 = vector.load %arg4[%c0_7, %c0_8] : memref<32x768xf32, #tpu.memory_space<vmem>>, vector<32x768xf32>
    %cst_9 = arith.constant dense<0.000000e+00> : vector<64x768xf32>
    %12 = tpu.matmul %10, %11, %cst_9 {dimension_numbers = #tpu.dot_dimension_numbers<[1], [0], [0], [1], [0, 0, 1, 1], [], []>} : vector<64x32xf32>, vector<32x768xf32>, vector<64x768xf32> -> vector<64x768xf32>
    %c0_10 = arith.constant 0 : index
    %c0_11 = arith.constant 0 : index
    %13 = vector.load %arg6[%c0_10, %c0_11] : memref<1x768xf32, #tpu.memory_space<vmem>>, vector<1x768xf32>
    %14 = vector.broadcast %13 : vector<1x768xf32> to vector<64x768xf32>
    %15 = arith.addf %12, %14 : vector<64x768xf32>
    %c0_12 = arith.constant 0 : index
    %c0_13 = arith.constant 0 : index
    %16 = vector.load %arg9[%c0_12, %c0_13] : memref<64x768xf32, #tpu.memory_space<vmem>>, vector<64x768xf32>
    tpu.vector_store %arg9[%c0_12, %c0_13], %15 {strides = array<i32>} : memref<64x768xf32, #tpu.memory_space<vmem>>, vector<64x768xf32>,
    %c0_14 = arith.constant 0 : index
    %c0_15 = arith.constant 0 : index
    %17 = vector.load %arg5[%c0_14, %c0_15] : memref<256x768xf32, #tpu.memory_space<vmem>>, vector<256x768xf32>
    %c0_16 = arith.constant 0 : index
    %c0_17 = arith.constant 0 : index
    %18 = vector.load %arg7[%c0_16, %c0_17] : memref<1x768xf32, #tpu.memory_space<vmem>>, vector<1x768xf32>
    %c8_i32 = arith.constant 8 : i32
    %19 = arith.muli %arg0, %c8_i32 : i32
    %c8_i32_18 = arith.constant 8 : i32
    %20 = arith.subi %c8_i32_18, %19 : i32
    %c8_i32_19 = arith.constant 8 : i32
    %21 = arith.minsi %c8_i32_19, %20 : i32
    %c0_20 = arith.constant 0 : index
    %c0_21 = arith.constant 0 : index
    %22 = vector.load %arg8[%c0_20, %c0_21] : memref<8x256xf32, #tpu.memory_space<vmem>>, vector<8x256xf32>
    %c0_i32_22 = arith.constant 0 : i32
    %23 = arith.subi %21, %c0_i32_22 : i32
    %24 = arith.addi %c0_i32_22, %23 : i32
    %c1_i32 = arith.constant 1 : i32
    %25 = scf.for %arg10 = %c0_i32_22 to %24 step %c1_i32 iter_args(%arg11 = %22) -> (vector<8x256xf32>)  : i32 {
      %c8_i32_25 = arith.constant 8 : i32
      %27 = arith.muli %arg10, %c8_i32_25 : i32
      %28 = tpu.assume_multiple %27, 8 : i32
      %29 = arith.index_cast %28 : i32 to index
      %c0_26 = arith.constant 0 : index
      %30 = vector.load %arg9[%29, %c0_26] : memref<64x768xf32, #tpu.memory_space<vmem>>, vector<8x768xf32>
      %cst_27 = arith.constant dense<0.000000e+00> : vector<8x768xf32>
      %31 = tpu.matmul %arg11, %17, %cst_27 {dimension_numbers = #tpu.dot_dimension_numbers<[1], [0], [0], [1], [0, 0, 1, 1], [], []>} : vector<8x256xf32>, vector<256x768xf32>, vector<8x768xf32> -> vector<8x768xf32>
      %32 = vector.broadcast %18 : vector<1x768xf32> to vector<8x768xf32>
      %33 = arith.addf %31, %32 : vector<8x768xf32>
      %34 = vector.extract_strided_slice %30 {offsets = [0, 0], sizes = [8, 256], strides = [1, 1]} : vector<8x768xf32> to vector<8x256xf32>
      %35 = vector.extract_strided_slice %33 {offsets = [0, 0], sizes = [8, 256], strides = [1, 1]} : vector<8x768xf32> to vector<8x256xf32>
      %36 = arith.addf %34, %35 : vector<8x256xf32>
      %37 = arith.negf %36 : vector<8x256xf32>
      %38 = math.exp %37 : vector<8x256xf32>
      %cst_28 = arith.constant 1.000000e+00 : f32
      %39 = vector.broadcast %cst_28 : f32 to vector<8x256xf32>
      %40 = arith.addf %39, %38 : vector<8x256xf32>
      %41 = arith.divf %39, %40 : vector<8x256xf32>
      %42 = vector.extract_strided_slice %30 {offsets = [0, 256], sizes = [8, 256], strides = [1, 1]} : vector<8x768xf32> to vector<8x256xf32>
      %43 = vector.extract_strided_slice %33 {offsets = [0, 256], sizes = [8, 256], strides = [1, 1]} : vector<8x768xf32> to vector<8x256xf32>
      %44 = arith.addf %42, %43 : vector<8x256xf32>
      %45 = arith.negf %44 : vector<8x256xf32>
      %46 = math.exp %45 : vector<8x256xf32>
      %cst_29 = arith.constant 1.000000e+00 : f32
      %47 = vector.broadcast %cst_29 : f32 to vector<8x256xf32>
      %48 = arith.addf %47, %46 : vector<8x256xf32>
      %49 = arith.divf %47, %48 : vector<8x256xf32>
      %50 = vector.extract_strided_slice %30 {offsets = [0, 512], sizes = [8, 256], strides = [1, 1]} : vector<8x768xf32> to vector<8x256xf32>
      %51 = vector.extract_strided_slice %33 {offsets = [0, 512], sizes = [8, 256], strides = [1, 1]} : vector<8x768xf32> to vector<8x256xf32>
      %52 = arith.mulf %41, %51 : vector<8x256xf32>
      %53 = arith.addf %50, %52 : vector<8x256xf32>
      %54 = math.tanh %53 : vector<8x256xf32>
      %cst_30 = arith.constant 1.000000e+00 : f32
      %55 = vector.broadcast %cst_30 : f32 to vector<8x256xf32>
      %56 = arith.subf %55, %49 : vector<8x256xf32>
      %57 = arith.mulf %56, %54 : vector<8x256xf32>
      %58 = arith.mulf %49, %arg11 : vector<8x256xf32>
      %59 = arith.addf %57, %58 : vector<8x256xf32>
      scf.yield %59 : vector<8x256xf32>
    }
    %c0_23 = arith.constant 0 : index
    %c0_24 = arith.constant 0 : index
    %26 = vector.load %arg8[%c0_23, %c0_24] : memref<8x256xf32, #tpu.memory_space<vmem>>, vector<8x256xf32>
    tpu.vector_store %arg8[%c0_23, %c0_24], %25 {strides = array<i32>} : memref<8x256xf32, #tpu.memory_space<vmem>>, vector<8x256xf32>,
    return
  }
  func.func @transform_0(%arg0: i32) -> (i32, i32) {
    %c0_i32 = arith.constant 0 : i32
    %c0_i32_0 = arith.constant 0 : i32
    return %arg0, %c0_i32 : i32, i32
  }
  func.func @transform_1(%arg0: i32) -> (i32, i32) {
    %c0_i32 = arith.constant 0 : i32
    %c0_i32_0 = arith.constant 0 : i32
    %c0_i32_1 = arith.constant 0 : i32
    return %c0_i32, %c0_i32_0 : i32, i32
  }
  func.func @transform_2(%arg0: i32) -> (i32, i32) {
    %c0_i32 = arith.constant 0 : i32
    %c0_i32_0 = arith.constant 0 : i32
    %c0_i32_1 = arith.constant 0 : i32
    return %c0_i32, %c0_i32_0 : i32, i32
  }
  func.func @transform_3(%arg0: i32) -> (i32, i32) {
    %c0_i32 = arith.constant 0 : i32
    %c0_i32_0 = arith.constant 0 : i32
    %c0_i32_1 = arith.constant 0 : i32
    return %c0_i32, %c0_i32_0 : i32, i32
  }
  func.func @transform_4(%arg0: i32) -> (i32, i32) {
    %c0_i32 = arith.constant 0 : i32
    %c0_i32_0 = arith.constant 0 : i32
    %c0_i32_1 = arith.constant 0 : i32
    return %c0_i32, %c0_i32_0 : i32, i32
  }
  func.func @transform_5(%arg0: i32) -> (i32, i32) {
    %c0_i32 = arith.constant 0 : i32
    %c0_i32_0 = arith.constant 0 : i32
    %c0_i32_1 = arith.constant 0 : i32
    return %c0_i32, %c0_i32_0 : i32, i32
  }
  func.func @transform_6(%arg0: i32) -> (i32, i32) {
    %c0_i32 = arith.constant 0 : i32
    %c0_i32_0 = arith.constant 0 : i32
    %c0_i32_1 = arith.constant 0 : i32
    return %c0_i32, %c0_i32_0 : i32, i32
  }
  func.func @transform_7(%arg0: i32) -> (i32, i32) {
    %c0_i32 = arith.constant 0 : i32
    %c0_i32_0 = arith.constant 0 : i32
    %c0_i32_1 = arith.constant 0 : i32
    return %c0_i32, %c0_i32_0 : i32, i32
  }
}

</mosaic_0001>

<bundles_post_ra>
// kernel: tpu_custom_call.1
= control target key start
LH: loop header
LB: loop body
LE: loop exit
PB: predicated region body
PF: predicated region fallthrough
CT: control target
= control target key end

     0   :  { %12 = vsyncpa [#allocation4], 0  ;;  %s2600_s0 = inlined_call_operand.vmem [shape: f32[64,27], index: 0, kind: input, shape index: {}]   ;;  %s2601_s1 = inlined_call_operand.vmem [shape: f32[27,32], index: 1, kind: input, shape index: {}]   ;;  %s2602_s2 = inlined_call_operand.vmem [shape: f32[1,32], index: 2, kind: input, shape index: {}]   ;;  %s2603_s3 = inlined_call_operand.hbm [shape: f32[32,768], index: 3, kind: input, shape index: {}]   ;;  %s2604_s4 = inlined_call_operand.hbm [shape: f32[256,768], index: 4, kind: input, shape index: {}]   ;;  %s2605_s5 = inlined_call_operand.vmem [shape: f32[1,768], index: 5, kind: input, shape index: {}]   ;;  %s2606_s6 = inlined_call_operand.vmem [shape: f32[1,768], index: 6, kind: input, shape index: {}]   ;;  %s2607_s7 = inlined_call_operand.hbm [shape: f32[8,256], index: 7, kind: output, shape index: {}]  }
   0x1   :  { %13 = vsyncpa [#allocation7], 0 }
   0x2   :  { %14 = vsyncpa [#allocation5], 0  ;;  %s1676_s24 = smov [#allocation3]   ;;  %s1580_s28 = scalar_lea.hbm %s2603_s3, 3072 }
   0x3   :  { %s26_s25 = sshll.u32 %s1676_s24, 4  ;;  %p1581_p0 = scmp.ne.s32.totalorder %s2603_s3, %s1580_s28  ;;  %s27_s25 = int_to_ptr.vmem [resolvable:$true] %s26_s25 }
   0x4   :  { %p1584_p1 = scmp.lt.u32.totalorder %s1580_s28, %s2603_s3 }
   0x6   :  { %p1586_p2 = pnand %p1584_p1, %p1581_p0 }
   0x8   :  { %1589 = shalt.err (!%p1586_p2)
}
   0x9   :  { %s1590_s10 = scalar_lea.vmem %s27_s25, 3072  ;;  %p1595_p4 = scmp.lt.s32.totalorder %s27_s25, %s27_s25 }
   0xa   :  { %p1591_p3 = scmp.ne.s32.totalorder %s27_s25, %s1590_s10  ;;  %p1596_p5 = scmp.lt.s32.totalorder %s1590_s10, %s1590_s10 }
   0xc   :  { %p1597_p6 = por %p1596_p5, %p1595_p4 }
   0xe   :  { %p1598_p7 = pnand %p1597_p6, %p1591_p3 }
  0x10   :  { %1601 = shalt.err (!%p1598_p7)
}
  0x11   :  { %s1677_s11 = smov 768   ;;  %s1678_s12 = smov 48  }
  0x12   :  { %32 = dma.hbm_to_vmem [thread:$0]  %s2603_s3, 3072, %s27_s25, [#allocation4], %s1677_s11, %s1677_s11, %s1678_s12  }
  0x13   :  { %s1679_s15 = smov [#allocation6]   ;;  %s1602_s19 = scalar_lea.hbm %s2604_s4, 24576 }
  0x14   :  { %s38_s16 = sshll.u32 %s1679_s15, 4  ;;  %p1603_p8 = scmp.ne.s32.totalorder %s2604_s4, %s1602_s19  ;;  %s39_s16 = int_to_ptr.vmem [resolvable:$true] %s38_s16 }
  0x15   :  { %p1606_p9 = scmp.lt.u32.totalorder %s1602_s19, %s2604_s4 }
  0x17   :  { %p1608_p10 = pnand %p1606_p9, %p1603_p8 }
  0x19   :  { %1611 = shalt.err (!%p1608_p10)
}
  0x1a   :  { %s1612_s24 = scalar_lea.vmem %s39_s16, 24576  ;;  %p1617_p12 = scmp.lt.s32.totalorder %s39_s16, %s39_s16 }
  0x1b   :  { %p1613_p11 = scmp.ne.s32.totalorder %s39_s16, %s1612_s24  ;;  %p1618_p13 = scmp.lt.s32.totalorder %s1612_s24, %s1612_s24 }
  0x1d   :  { %p1619_p0 = por %p1618_p13, %p1617_p12 }
  0x1f   :  { %p1620_p1 = pnand %p1619_p0, %p1613_p11 }
  0x21   :  { %1623 = shalt.err (!%p1620_p1)
}
  0x22   :  { %44 = dma.hbm_to_vmem [thread:$0]  %s2604_s4, 24576, %s39_s16, [#allocation7], %s1677_s11, %s1677_s11, %s1678_s12  }
  0x23   :  { %1658 = dma.done.wait [#allocation4], 3072  }
  0x24   :  { %1659 = vsyncadd [#allocation4], 4294964224 }
  0x25   :  { %1660 = dma.done.wait [#allocation7], 24576  }
  0x26   :  { %1661 = vsyncadd [#allocation7], 4294942720  ;;  %v1747_v0 = vld [vmem:[#allocation6] sm:$0xff]  ;;  %v1749_v1 = vld [vmem:[#allocation6 + $0x8] sm:$0xff]  ;;  %vm105_vm0 = vcmask 1042432   ;;  %vm80_vm1 = vcmask 220160  }
  0x27   :  { %2617 = vst [vmem:[#allocation12_spill] sm:$0xff] %v1747_v0  ;;  %v1751_v2 = vld [vmem:[#allocation6 + $0x10] sm:$0xff]  ;;  %v1753_v3 = vld [vmem:[#allocation6 + $0x18] sm:$0xff]  ;;  %v1755_v4 = vld [vmem:[#allocation6 + $0x20] sm:$0xff]  ;;  %vm1680_vm2 = vmmov 1   ;;  %vm278_vm4 = vcmask 261120  }
  0x28   :  { %2618 = vst [vmem:[#allocation13_spill] sm:$0xff] %v1755_v4  ;;  %v1757_v5 = vld [vmem:[#allocation6 + $0x28] sm:$0xff]  ;;  %v1759_v6 = vld [vmem:[#allocation6 + $0x30] sm:$0xff]  ;;  %v1761_v7 = vld [vmem:[#allocation6 + $0x38] sm:$0xff] }
  0x29   :  { %2619 = vst [vmem:[#allocation14_spill] sm:$0xff] %v1757_v5  ;;  %v1763_v8 = vld [vmem:[#allocation6 + $0x40] sm:$0xff]  ;;  %v1765_v9 = vld [vmem:[#allocation6 + $0x48] sm:$0xff]  ;;  %v1767_v10 = vld [vmem:[#allocation6 + $0x50] sm:$0xff] }
  0x2a   :  { %2620 = vst [vmem:[#allocation15_spill] sm:$0xff] %v1767_v10  ;;  %v1769_v11 = vld [vmem:[#allocation6 + $0x58] sm:$0xff]  ;;  %v1771_v12 = vld [vmem:[#allocation6 + $0x60] sm:$0xff]  ;;  %v1773_v13 = vld [vmem:[#allocation6 + $0x68] sm:$0xff] }
  0x2b   :  { %2621 = vst [vmem:[#allocation16_spill] sm:$0xff] %v1769_v11  ;;  %v1775_v14 = vld [vmem:[#allocation6 + $0x70] sm:$0xff]  ;;  %v1777_v15 = vld [vmem:[#allocation6 + $0x78] sm:$0xff]  ;;  %v1779_v16 = vld [vmem:[#allocation6 + $0x80] sm:$0xff] }
  0x2c   :  { %2622 = vst [vmem:[#allocation17_spill] sm:$0xff] %v1779_v16  ;;  %v1781_v17 = vld [vmem:[#allocation6 + $0x88] sm:$0xff]  ;;  %v1783_v18 = vld [vmem:[#allocation6 + $0x90] sm:$0xff]  ;;  %v1785_v19 = vld [vmem:[#allocation6 + $0x98] sm:$0xff] }
  0x2d   :  { %2623 = vst [vmem:[#allocation18_spill] sm:$0xff] %v1781_v17  ;;  %v1787_v20 = vld [vmem:[#allocation6 + $0xa0] sm:$0xff]  ;;  %v1789_v21 = vld [vmem:[#allocation6 + $0xa8] sm:$0xff]  ;;  %v1791_v22 = vld [vmem:[#allocation6 + $0xb0] sm:$0xff] }
  0x2e   :  { %2624 = vst [vmem:[#allocation19_spill] sm:$0xff] %v1791_v22  ;;  %v1793_v23 = vld [vmem:[#allocation6 + $0xb8] sm:$0xff]  ;;  %v1795_v24 = vld [vmem:[#allocation6 + $0xc0] sm:$0xff]  ;;  %v1797_v25 = vld [vmem:[#allocation6 + $0xc8] sm:$0xff] }
  0x2f   :  { %2625 = vst [vmem:[#allocation20_spill] sm:$0xff] %v1793_v23  ;;  %v1799_v26 = vld [vmem:[#allocation6 + $0xd0] sm:$0xff]  ;;  %v1801_v27 = vld [vmem:[#allocation6 + $0xd8] sm:$0xff]  ;;  %v1803_v28 = vld [vmem:[#allocation6 + $0xe0] sm:$0xff] }
  0x30   :  { %2626 = vst [vmem:[#allocation21_spill] sm:$0xff] %v1803_v28  ;;  %v1805_v29 = vld [vmem:[#allocation6 + $0xe8] sm:$0xff]  ;;  %v1807_v30 = vld [vmem:[#allocation6 + $0xf0] sm:$0xff]  ;;  %v1809_v31 = vld [vmem:[#allocation6 + $0xf8] sm:$0xff] }
  0x31   :  { %2627 = vst [vmem:[#allocation22_spill] sm:$0xff] %v1805_v29  ;;  %v1811_v32 = vld [vmem:[#allocation6 + $0x100] sm:$0xff]  ;;  %v1813_v33 = vld [vmem:[#allocation6 + $0x108] sm:$0xff]  ;;  %v1815_v34 = vld [vmem:[#allocation6 + $0x110] sm:$0xff] }
  0x32   :  { %2628 = vst [vmem:[#allocation23_spill] sm:$0xff] %v1815_v34  ;;  %v1817_v35 = vld [vmem:[#allocation6 + $0x118] sm:$0xff]  ;;  %v1819_v36 = vld [vmem:[#allocation6 + $0x120] sm:$0xff]  ;;  %v1821_v37 = vld [vmem:[#allocation6 + $0x128] sm:$0xff] }
  0x33   :  { %2629 = vst [vmem:[#allocation24_spill] sm:$0xff] %v1817_v35  ;;  %v1823_v38 = vld [vmem:[#allocation6 + $0x130] sm:$0xff]  ;;  %v1825_v39 = vld [vmem:[#allocation6 + $0x138] sm:$0xff]  ;;  %v1827_v40 = vld [vmem:[#allocation6 + $0x140] sm:$0xff] }
  0x34   :  { %2630 = vst [vmem:[#allocation25_spill] sm:$0xff] %v1827_v40  ;;  %v1829_v41 = vld [vmem:[#allocation6 + $0x148] sm:$0xff]  ;;  %v1831_v42 = vld [vmem:[#allocation6 + $0x150] sm:$0xff]  ;;  %v1833_v43 = vld [vmem:[#allocation6 + $0x158] sm:$0xff] }
  0x35   :  { %2631 = vst [vmem:[#allocation26_spill] sm:$0xff] %v1829_v41  ;;  %v1835_v44 = vld [vmem:[#allocation6 + $0x160] sm:$0xff]  ;;  %v1837_v45 = vld [vmem:[#allocation6 + $0x168] sm:$0xff]  ;;  %v1839_v46 = vld [vmem:[#allocation6 + $0x170] sm:$0xff] }
  0x36   :  { %2632 = vst [vmem:[#allocation27_spill] sm:$0xff] %v1839_v46  ;;  %v1841_v47 = vld [vmem:[#allocation6 + $0x178] sm:$0xff]  ;;  %v1843_v48 = vld [vmem:[#allocation6 + $0x180] sm:$0xff]  ;;  %v1845_v49 = vld [vmem:[#allocation6 + $0x188] sm:$0xff] }
  0x37   :  { %2633 = vst [vmem:[#allocation28_spill] sm:$0xff] %v1841_v47  ;;  %v1847_v50 = vld [vmem:[#allocation6 + $0x190] sm:$0xff]  ;;  %v1849_v51 = vld [vmem:[#allocation6 + $0x198] sm:$0xff]  ;;  %v1851_v52 = vld [vmem:[#allocation6 + $0x1a0] sm:$0xff] }
  0x38   :  { %2634 = vst [vmem:[#allocation29_spill] sm:$0xff] %v1847_v50  ;;  %2635 = vst [vmem:[#allocation30_spill] sm:$0xff] %v1851_v52  ;;  %v1853_v53 = vld [vmem:[#allocation6 + $0x1a8] sm:$0xff]  ;;  %v1855_v54 = vld [vmem:[#allocation6 + $0x1b0] sm:$0xff] }
  0x39   :  { %2636 = vst [vmem:[#allocation31_spill] sm:$0xff] %v1853_v53  ;;  %v1857_v55 = vld [vmem:[#allocation6 + $0x1b8] sm:$0xff]  ;;  %v1859_v56 = vld [vmem:[#allocation6 + $0x1c0] sm:$0xff]  ;;  %v1861_v57 = vld [vmem:[#allocation6 + $0x1c8] sm:$0xff] }
  0x3a   :  { %2637 = vst [vmem:[#allocation32_spill] sm:$0xff] %v1859_v56  ;;  %v1863_v58 = vld [vmem:[#allocation6 + $0x1d0] sm:$0xff]  ;;  %v1865_v59 = vld [vmem:[#allocation6 + $0x1d8] sm:$0xff]  ;;  %v1867_v60 = vld [vmem:[#allocation6 + $0x1e0] sm:$0xff] }
  0x3b   :  { %2638 = vst [vmem:[#allocation33_spill] sm:$0xff] %v1863_v58  ;;  %2639 = vst [vmem:[#allocation34_spill] sm:$0xff] %v1865_v59  ;;  %v1869_v61 = vld [vmem:[#allocation6 + $0x1e8] sm:$0xff]  ;;  %v1871_v62 = vld [vmem:[#allocation6 + $0x1f0] sm:$0xff] }
  0x3c   :  { %2640 = vst [vmem:[#allocation35_spill] sm:$0xff] %v1867_v60  ;;  %2641 = vst [vmem:[#allocation36_spill] sm:$0xff] %v1871_v62  ;;  %v1873_v63 = vld [vmem:[#allocation6 + $0x1f8] sm:$0xff]  ;;  %v1875_v52 = vld [vmem:[#allocation6 + $0x200] sm:$0xff] }
  0x3d   :  { %2642 = vst [vmem:[#allocation37_spill] sm:$0xff] %v1873_v63  ;;  %2643 = vst [vmem:[#allocation38_spill] sm:$0xff] %v1875_v52  ;;  %v1877_v53 = vld [vmem:[#allocation6 + $0x208] sm:$0xff]  ;;  %v1879_v46 = vld [vmem:[#allocation6 + $0x210] sm:$0xff] }
  0x3e   :  { %2644 = vst [vmem:[#allocation39_spill] sm:$0xff] %v1877_v53  ;;  %2645 = vst [vmem:[#allocation40_spill] sm:$0xff] %v1879_v46  ;;  %v1881_v40 = vld [vmem:[#allocation6 + $0x218] sm:$0xff]  ;;  %v1883_v47 = vld [vmem:[#allocation6 + $0x220] sm:$0xff] }
  0x3f   :  { %2646 = vst [vmem:[#allocation41_spill] sm:$0xff] %v1883_v47  ;;  %v1885_v58 = vld [vmem:[#allocation6 + $0x228] sm:$0xff]  ;;  %v1887_v59 = vld [vmem:[#allocation6 + $0x230] sm:$0xff]  ;;  %v1889_v41 = vld [vmem:[#allocation6 + $0x238] sm:$0xff] }
  0x40   :  { %2647 = vst [vmem:[#allocation42_spill] sm:$0xff] %v1885_v58  ;;  %2648 = vst [vmem:[#allocation43_spill] sm:$0xff] %v1887_v59  ;;  %v1891_v34 = vld [vmem:[#allocation6 + $0x240] sm:$0xff]  ;;  %v1893_v28 = vld [vmem:[#allocation6 + $0x248] sm:$0xff] }
  0x41   :  { %2649 = vst [vmem:[#allocation44_spill] sm:$0xff] %v1889_v41  ;;  %2650 = vst [vmem:[#allocation45_spill] sm:$0xff] %v1891_v34  ;;  %v1895_v35 = vld [vmem:[#allocation6 + $0x250] sm:$0xff]  ;;  %v1897_v52 = vld [vmem:[#allocation6 + $0x258] sm:$0xff] }
  0x42   :  { %2651 = vst [vmem:[#allocation46_spill] sm:$0xff] %v1893_v28  ;;  %2652 = vst [vmem:[#allocation47_spill] sm:$0xff] %v1895_v35  ;;  %v1899_v53 = vld [vmem:[#allocation6 + $0x260] sm:$0xff]  ;;  %v1901_v29 = vld [vmem:[#allocation6 + $0x268] sm:$0xff] }
  0x43   :  { %2653 = vst [vmem:[#allocation48_spill] sm:$0xff] %v1897_v52  ;;  %2654 = vst [vmem:[#allocation49_spill] sm:$0xff] %v1899_v53  ;;  %v1903_v22 = vld [vmem:[#allocation6 + $0x270] sm:$0xff]  ;;  %v1905_v16 = vld [vmem:[#allocation6 + $0x278] sm:$0xff] }
  0x44   :  { %2655 = vst [vmem:[#allocation50_spill] sm:$0xff] %v1901_v29  ;;  %2656 = vst [vmem:[#allocation51_spill] sm:$0xff] %v1903_v22  ;;  %v1907_v23 = vld [vmem:[#allocation6 + $0x280] sm:$0xff]  ;;  %v1909_v59 = vld [vmem:[#allocation6 + $0x288] sm:$0xff] }
  0x45   :  { %2657 = vst [vmem:[#allocation52_spill] sm:$0xff] %v1905_v16  ;;  %2658 = vst [vmem:[#allocation53_spill] sm:$0xff] %v1907_v23  ;;  %v1911_v41 = vld [vmem:[#allocation6 + $0x290] sm:$0xff]  ;;  %v1913_v17 = vld [vmem:[#allocation6 + $0x298] sm:$0xff] }
  0x46   :  { %2659 = vst [vmem:[#allocation54_spill] sm:$0xff] %v1909_v59  ;;  %2660 = vst [vmem:[#allocation55_spill] sm:$0xff] %v1911_v41  ;;  %v1915_v10 = vld [vmem:[#allocation6 + $0x2a0] sm:$0xff]  ;;  %v1917_v4 = vld [vmem:[#allocation6 + $0x2a8] sm:$0xff] }
  0x47   :  { %2661 = vst [vmem:[#allocation56_spill] sm:$0xff] %v1913_v17  ;;  %2662 = vst [vmem:[#allocation57_spill] sm:$0xff] %v1915_v10  ;;  %v1919_v11 = vld [vmem:[#allocation6 + $0x2b0] sm:$0xff]  ;;  %v1921_v53 = vld [vmem:[#allocation6 + $0x2b8] sm:$0xff] }
  0x48   :  { %2663 = vst [vmem:[#allocation58_spill] sm:$0xff] %v1917_v4  ;;  %2664 = vst [vmem:[#allocation59_spill] sm:$0xff] %v1919_v11  ;;  %v1923_v29 = vld [vmem:[#allocation6 + $0x2c0] sm:$0xff]  ;;  %v1925_v5 = vld [vmem:[#allocation6 + $0x2c8] sm:$0xff] }
  0x49   :  { %2665 = vst [vmem:[#allocation60_spill] sm:$0xff] %v1921_v53  ;;  %2666 = vst [vmem:[#allocation61_spill] sm:$0xff] %v1923_v29  ;;  %v1927_v35 = vld [vmem:[#allocation6 + $0x2d0] sm:$0xff]  ;;  %v1929_v23 = vld [vmem:[#allocation6 + $0x2d8] sm:$0xff] }
  0x4a   :  { %2667 = vst [vmem:[#allocation62_spill] sm:$0xff] %v1925_v5  ;;  %2668 = vst [vmem:[#allocation63_spill] sm:$0xff] %v1927_v35  ;;  %v1931_v59 = vld [vmem:[#allocation6 + $0x2e0] sm:$0xff]  ;;  %v1933_v41 = vld [vmem:[#allocation6 + $0x2e8] sm:$0xff] }
  0x4b   :  { %2669 = vst [vmem:[#allocation64_spill] sm:$0xff] %v1929_v23  ;;  %2670 = vst [vmem:[#allocation65_spill] sm:$0xff] %v1931_v59  ;;  %v1935_v17 = vld [vmem:[#allocation6 + $0x2f0] sm:$0xff]  ;;  %v1937_v10 = vld [vmem:[#allocation6 + $0x2f8] sm:$0xff] }
  0x4c   :  { %2671 = vst [vmem:[#allocation66_spill] sm:$0xff] %v1933_v41  ;;  %2672 = vst [vmem:[#allocation67_spill] sm:$0xff] %v1935_v17  ;;  %v1939_v52 = vld [vmem:[#allocation6 + $0x300] sm:$0xff]  ;;  %v1941_v11 = vld [vmem:[#allocation6 + $0x308] sm:$0xff] }
  0x4d   :  { %2673 = vst [vmem:[#allocation68_spill] sm:$0xff] %v1937_v10  ;;  %2674 = vst [vmem:[#allocation69_spill] sm:$0xff] %v1939_v52  ;;  %v1943_v53 = vld [vmem:[#allocation6 + $0x310] sm:$0xff]  ;;  %v1945_v29 = vld [vmem:[#allocation6 + $0x318] sm:$0xff] }
  0x4e   :  { %2675 = vst [vmem:[#allocation70_spill] sm:$0xff] %v1941_v11  ;;  %2676 = vst [vmem:[#allocation71_spill] sm:$0xff] %v1943_v53  ;;  %v1947_v5 = vld [vmem:[#allocation6 + $0x320] sm:$0xff]  ;;  %v1949_v35 = vld [vmem:[#allocation6 + $0x328] sm:$0xff] }
  0x4f   :  { %2677 = vst [vmem:[#allocation72_spill] sm:$0xff] %v1945_v29  ;;  %2678 = vst [vmem:[#allocation73_spill] sm:$0xff] %v1947_v5  ;;  %v1951_v47 = vld [vmem:[#allocation6 + $0x330] sm:$0xff]  ;;  %v1953_v59 = vld [vmem:[#allocation6 + $0x338] sm:$0xff] }
  0x50   :  { %2679 = vst [vmem:[#allocation74_spill] sm:$0xff] %v1949_v35  ;;  %2680 = vst [vmem:[#allocation75_spill] sm:$0xff] %v1951_v47  ;;  %v1955_v41 = vld [vmem:[#allocation6 + $0x340] sm:$0xff]  ;;  %v1957_v17 = vld [vmem:[#allocation6 + $0x348] sm:$0xff] }
  0x51   :  { %2681 = vst [vmem:[#allocation76_spill] sm:$0xff] %v1953_v59  ;;  %2682 = vst [vmem:[#allocation77_spill] sm:$0xff] %v1955_v41  ;;  %v1959_v10 = vld [vmem:[#allocation6 + $0x350] sm:$0xff]  ;;  %v1961_v52 = vld [vmem:[#allocation6 + $0x358] sm:$0xff] }
  0x52   :  { %2683 = vst [vmem:[#allocation78_spill] sm:$0xff] %v1957_v17  ;;  %2684 = vst [vmem:[#allocation79_spill] sm:$0xff] %v1959_v10  ;;  %v1963_v11 = vld [vmem:[#allocation6 + $0x360] sm:$0xff]  ;;  %v1965_v53 = vld [vmem:[#allocation6 + $0x368] sm:$0xff] }
  0x53   :  { %2685 = vst [vmem:[#allocation80_spill] sm:$0xff] %v1961_v52  ;;  %2686 = vst [vmem:[#allocation81_spill] sm:$0xff] %v1963_v11  ;;  %v1967_v29 = vld [vmem:[#allocation6 + $0x370] sm:$0xff]  ;;  %v1969_v5 = vld [vmem:[#allocation6 + $0x378] sm:$0xff] }
  0x54   :  { %2687 = vst [vmem:[#allocation82_spill] sm:$0xff] %v1965_v53  ;;  %2688 = vst [vmem:[#allocation83_spill] sm:$0xff] %v1967_v29  ;;  %v1971_v35 = vld [vmem:[#allocation6 + $0x380] sm:$0xff]  ;;  %v1973_v47 = vld [vmem:[#allocation6 + $0x388] sm:$0xff] }
  0x55   :  { %2689 = vst [vmem:[#allocation84_spill] sm:$0xff] %v1969_v5  ;;  %2690 = vst [vmem:[#allocation85_spill] sm:$0xff] %v1971_v35  ;;  %v1975_v59 = vld [vmem:[#allocation6 + $0x390] sm:$0xff]  ;;  %v1977_v41 = vld [vmem:[#allocation6 + $0x398] sm:$0xff] }
  0x56   :  { %2691 = vst [vmem:[#allocation86_spill] sm:$0xff] %v1973_v47  ;;  %2692 = vst [vmem:[#allocation87_spill] sm:$0xff] %v1975_v59  ;;  %v1979_v17 = vld [vmem:[#allocation6 + $0x3a0] sm:$0xff]  ;;  %v1981_v10 = vld [vmem:[#allocation6 + $0x3a8] sm:$0xff] }
  0x57   :  { %2693 = vst [vmem:[#allocation88_spill] sm:$0xff] %v1977_v41  ;;  %2694 = vst [vmem:[#allocation89_spill] sm:$0xff] %v1979_v17  ;;  %v1983_v52 = vld [vmem:[#allocation6 + $0x3b0] sm:$0xff]  ;;  %v1985_v11 = vld [vmem:[#allocation6 + $0x3b8] sm:$0xff] }
  0x58   :  { %2695 = vst [vmem:[#allocation90_spill] sm:$0xff] %v1981_v10  ;;  %2696 = vst [vmem:[#allocation91_spill] sm:$0xff] %v1983_v52  ;;  %v1987_v53 = vld [vmem:[#allocation6 + $0x3c0] sm:$0xff]  ;;  %v1989_v29 = vld [vmem:[#allocation6 + $0x3c8] sm:$0xff] }
  0x59   :  { %2697 = vst [vmem:[#allocation92_spill] sm:$0xff] %v1985_v11  ;;  %2698 = vst [vmem:[#allocation93_spill] sm:$0xff] %v1987_v53  ;;  %v1991_v5 = vld [vmem:[#allocation6 + $0x3d0] sm:$0xff]  ;;  %v1993_v35 = vld [vmem:[#allocation6 + $0x3d8] sm:$0xff] }
  0x5a   :  { %2699 = vst [vmem:[#allocation94_spill] sm:$0xff] %v1989_v29  ;;  %2700 = vst [vmem:[#allocation95_spill] sm:$0xff] %v1991_v5  ;;  %v1995_v47 = vld [vmem:[#allocation6 + $0x3e0] sm:$0xff]  ;;  %v1997_v59 = vld [vmem:[#allocation6 + $0x3e8] sm:$0xff] }
  0x5b   :  { %2701 = vst [vmem:[#allocation96_spill] sm:$0xff] %v1993_v35  ;;  %2702 = vst [vmem:[#allocation97_spill] sm:$0xff] %v1995_v47  ;;  %v1999_v41 = vld [vmem:[#allocation6 + $0x3f0] sm:$0xff]  ;;  %v2001_v17 = vld [vmem:[#allocation6 + $0x3f8] sm:$0xff] }
  0x5c   :  { %2703 = vst [vmem:[#allocation98_spill] sm:$0xff] %v1997_v59  ;;  %2704 = vst [vmem:[#allocation99_spill] sm:$0xff] %v1999_v41  ;;  %v2003_v10 = vld [vmem:[#allocation6 + $0x400] sm:$0xff]  ;;  %v2005_v52 = vld [vmem:[#allocation6 + $0x408] sm:$0xff] }
  0x5d   :  { %2705 = vst [vmem:[#allocation100_spill] sm:$0xff] %v2001_v17  ;;  %2706 = vst [vmem:[#allocation101_spill] sm:$0xff] %v2003_v10  ;;  %v2007_v11 = vld [vmem:[#allocation6 + $0x410] sm:$0xff]  ;;  %v2009_v53 = vld [vmem:[#allocation6 + $0x418] sm:$0xff] }
  0x5e   :  { %2707 = vst [vmem:[#allocation102_spill] sm:$0xff] %v2005_v52  ;;  %2708 = vst [vmem:[#allocation103_spill] sm:$0xff] %v2007_v11  ;;  %v2011_v29 = vld [vmem:[#allocation6 + $0x420] sm:$0xff]  ;;  %v2013_v5 = vld [vmem:[#allocation6 + $0x428] sm:$0xff] }
  0x5f   :  { %2709 = vst [vmem:[#allocation104_spill] sm:$0xff] %v2009_v53  ;;  %2710 = vst [vmem:[#allocation105_spill] sm:$0xff] %v2011_v29  ;;  %v2015_v35 = vld [vmem:[#allocation6 + $0x430] sm:$0xff]  ;;  %v2017_v47 = vld [vmem:[#allocation6 + $0x438] sm:$0xff] }
  0x60   :  { %2711 = vst [vmem:[#allocation106_spill] sm:$0xff] %v2013_v5  ;;  %2712 = vst [vmem:[#allocation107_spill] sm:$0xff] %v2015_v35  ;;  %v2019_v59 = vld [vmem:[#allocation6 + $0x440] sm:$0xff]  ;;  %v2021_v41 = vld [vmem:[#allocation6 + $0x448] sm:$0xff] }
  0x61   :  { %2713 = vst [vmem:[#allocation108_spill] sm:$0xff] %v2017_v47  ;;  %2714 = vst [vmem:[#allocation109_spill] sm:$0xff] %v2019_v59  ;;  %v2023_v17 = vld [vmem:[#allocation6 + $0x450] sm:$0xff]  ;;  %v2025_v10 = vld [vmem:[#allocation6 + $0x458] sm:$0xff] }
  0x62   :  { %2715 = vst [vmem:[#allocation110_spill] sm:$0xff] %v2021_v41  ;;  %2716 = vst [vmem:[#allocation111_spill] sm:$0xff] %v2023_v17  ;;  %v2027_v52 = vld [vmem:[#allocation6 + $0x460] sm:$0xff]  ;;  %v2029_v11 = vld [vmem:[#allocation6 + $0x468] sm:$0xff] }
  0x63   :  { %2717 = vst [vmem:[#allocation112_spill] sm:$0xff] %v2025_v10  ;;  %2718 = vst [vmem:[#allocation113_spill] sm:$0xff] %v2027_v52  ;;  %v2031_v53 = vld [vmem:[#allocation6 + $0x470] sm:$0xff]  ;;  %v2033_v29 = vld [vmem:[#allocation6 + $0x478] sm:$0xff] }
  0x64   :  { %2719 = vst [vmem:[#allocation114_spill] sm:$0xff] %v2029_v11  ;;  %2720 = vst [vmem:[#allocation115_spill] sm:$0xff] %v2031_v53  ;;  %v2035_v5 = vld [vmem:[#allocation6 + $0x480] sm:$0xff]  ;;  %v2037_v35 = vld [vmem:[#allocation6 + $0x488] sm:$0xff] }
  0x65   :  { %2721 = vst [vmem:[#allocation116_spill] sm:$0xff] %v2033_v29  ;;  %2722 = vst [vmem:[#allocation117_spill] sm:$0xff] %v2035_v5  ;;  %v2039_v47 = vld [vmem:[#allocation6 + $0x490] sm:$0xff]  ;;  %v2041_v59 = vld [vmem:[#allocation6 + $0x498] sm:$0xff] }
  0x66   :  { %2723 = vst [vmem:[#allocation118_spill] sm:$0xff] %v2037_v35  ;;  %2724 = vst [vmem:[#allocation119_spill] sm:$0xff] %v2039_v47  ;;  %v2043_v41 = vld [vmem:[#allocation6 + $0x4a0] sm:$0xff]  ;;  %v2045_v17 = vld [vmem:[#allocation6 + $0x4a8] sm:$0xff] }
  0x67   :  { %2725 = vst [vmem:[#allocation120_spill] sm:$0xff] %v2041_v59  ;;  %2726 = vst [vmem:[#allocation121_spill] sm:$0xff] %v2043_v41  ;;  %v2047_v10 = vld [vmem:[#allocation6 + $0x4b0] sm:$0xff]  ;;  %v2049_v52 = vld [vmem:[#allocation6 + $0x4b8] sm:$0xff] }
  0x68   :  { %2727 = vst [vmem:[#allocation122_spill] sm:$0xff] %v2045_v17  ;;  %2728 = vst [vmem:[#allocation123_spill] sm:$0xff] %v2047_v10  ;;  %v2051_v11 = vld [vmem:[#allocation6 + $0x4c0] sm:$0xff]  ;;  %v2053_v53 = vld [vmem:[#allocation6 + $0x4c8] sm:$0xff] }
  0x69   :  { %2729 = vst [vmem:[#allocation124_spill] sm:$0xff] %v2049_v52  ;;  %2730 = vst [vmem:[#allocation125_spill] sm:$0xff] %v2051_v11  ;;  %v2055_v29 = vld [vmem:[#allocation6 + $0x4d0] sm:$0xff]  ;;  %v2057_v5 = vld [vmem:[#allocation6 + $0x4d8] sm:$0xff] }
  0x6a   :  { %2731 = vst [vmem:[#allocation126_spill] sm:$0xff] %v2053_v53  ;;  %2732 = vst [vmem:[#allocation127_spill] sm:$0xff] %v2055_v29  ;;  %v2059_v35 = vld [vmem:[#allocation6 + $0x4e0] sm:$0xff]  ;;  %v2061_v47 = vld [vmem:[#allocation6 + $0x4e8] sm:$0xff] }
  0x6b   :  { %2733 = vst [vmem:[#allocation128_spill] sm:$0xff] %v2057_v5  ;;  %2734 = vst [vmem:[#allocation129_spill] sm:$0xff] %v2059_v35  ;;  %v2063_v59 = vld [vmem:[#allocation6 + $0x4f0] sm:$0xff]  ;;  %v2065_v41 = vld [vmem:[#allocation6 + $0x4f8] sm:$0xff] }
  0x6c   :  { %2735 = vst [vmem:[#allocation130_spill] sm:$0xff] %v2061_v47  ;;  %2736 = vst [vmem:[#allocation131_spill] sm:$0xff] %v2063_v59  ;;  %v2067_v17 = vld [vmem:[#allocation6 + $0x500] sm:$0xff]  ;;  %v2069_v10 = vld [vmem:[#allocation6 + $0x508] sm:$0xff] }
  0x6d   :  { %2737 = vst [vmem:[#allocation132_spill] sm:$0xff] %v2065_v41  ;;  %2738 = vst [vmem:[#allocation133_spill] sm:$0xff] %v2067_v17  ;;  %v2071_v52 = vld [vmem:[#allocation6 + $0x510] sm:$0xff]  ;;  %v2073_v11 = vld [vmem:[#allocation6 + $0x518] sm:$0xff] }
  0x6e   :  { %2739 = vst [vmem:[#allocation134_spill] sm:$0xff] %v2069_v10  ;;  %2740 = vst [vmem:[#allocation135_spill] sm:$0xff] %v2071_v52  ;;  %v2075_v53 = vld [vmem:[#allocation6 + $0x520] sm:$0xff]  ;;  %v2077_v29 = vld [vmem:[#allocation6 + $0x528] sm:$0xff] }
  0x6f   :  { %2741 = vst [vmem:[#allocation136_spill] sm:$0xff] %v2073_v11  ;;  %2742 = vst [vmem:[#allocation137_spill] sm:$0xff] %v2075_v53  ;;  %v2079_v5 = vld [vmem:[#allocation6 + $0x530] sm:$0xff]  ;;  %v2081_v35 = vld [vmem:[#allocation6 + $0x538] sm:$0xff] }
  0x70   :  { %2743 = vst [vmem:[#allocation138_spill] sm:$0xff] %v2077_v29  ;;  %2744 = vst [vmem:[#allocation139_spill] sm:$0xff] %v2079_v5  ;;  %v2083_v47 = vld [vmem:[#allocation6 + $0x540] sm:$0xff]  ;;  %v2085_v59 = vld [vmem:[#allocation6 + $0x548] sm:$0xff] }
  0x71   :  { %2745 = vst [vmem:[#allocation140_spill] sm:$0xff] %v2081_v35  ;;  %2746 = vst [vmem:[#allocation141_spill] sm:$0xff] %v2083_v47  ;;  %v2087_v41 = vld [vmem:[#allocation6 + $0x550] sm:$0xff]  ;;  %v2089_v17 = vld [vmem:[#allocation6 + $0x558] sm:$0xff] }
  0x72   :  { %2747 = vst [vmem:[#allocation142_spill] sm:$0xff] %v2085_v59  ;;  %2748 = vst [vmem:[#allocation143_spill] sm:$0xff] %v2087_v41  ;;  %v2091_v10 = vld [vmem:[#allocation6 + $0x560] sm:$0xff]  ;;  %v2093_v52 = vld [vmem:[#allocation6 + $0x568] sm:$0xff] }
  0x73   :  { %2749 = vst [vmem:[#allocation144_spill] sm:$0xff] %v2089_v17  ;;  %2750 = vst [vmem:[#allocation145_spill] sm:$0xff] %v2091_v10  ;;  %v2095_v11 = vld [vmem:[#allocation6 + $0x570] sm:$0xff]  ;;  %v2097_v53 = vld [vmem:[#allocation6 + $0x578] sm:$0xff] }
  0x74   :  { %2751 = vst [vmem:[#allocation146_spill] sm:$0xff] %v2093_v52  ;;  %2752 = vst [vmem:[#allocation147_spill] sm:$0xff] %v2095_v11  ;;  %v2099_v29 = vld [vmem:[#allocation6 + $0x580] sm:$0xff]  ;;  %v2101_v5 = vld [vmem:[#allocation6 + $0x588] sm:$0xff] }
  0x75   :  { %2753 = vst [vmem:[#allocation148_spill] sm:$0xff] %v2097_v53  ;;  %2754 = vst [vmem:[#allocation149_spill] sm:$0xff] %v2099_v29  ;;  %v2103_v35 = vld [vmem:[#allocation6 + $0x590] sm:$0xff]  ;;  %v2105_v47 = vld [vmem:[#allocation6 + $0x598] sm:$0xff] }
  0x76   :  { %2755 = vst [vmem:[#allocation150_spill] sm:$0xff] %v2101_v5  ;;  %2756 = vst [vmem:[#allocation151_spill] sm:$0xff] %v2103_v35  ;;  %v2107_v59 = vld [vmem:[#allocation6 + $0x5a0] sm:$0xff]  ;;  %v2109_v41 = vld [vmem:[#allocation6 + $0x5a8] sm:$0xff] }
  0x77   :  { %2757 = vst [vmem:[#allocation152_spill] sm:$0xff] %v2105_v47  ;;  %2758 = vst [vmem:[#allocation153_spill] sm:$0xff] %v2107_v59  ;;  %v2111_v17 = vld [vmem:[#allocation6 + $0x5b0] sm:$0xff]  ;;  %v2113_v10 = vld [vmem:[#allocation6 + $0x5b8] sm:$0xff] }
  0x78   :  { %2759 = vst [vmem:[#allocation154_spill] sm:$0xff] %v2109_v41  ;;  %2760 = vst [vmem:[#allocation155_spill] sm:$0xff] %v2111_v17  ;;  %v2115_v52 = vld [vmem:[#allocation6 + $0x5c0] sm:$0xff]  ;;  %v2117_v11 = vld [vmem:[#allocation6 + $0x5c8] sm:$0xff] }
  0x79   :  { %2761 = vst [vmem:[#allocation156_spill] sm:$0xff] %v2113_v10  ;;  %2762 = vst [vmem:[#allocation157_spill] sm:$0xff] %v2115_v52  ;;  %v2119_v53 = vld [vmem:[#allocation6 + $0x5d0] sm:$0xff]  ;;  %v2121_v29 = vld [vmem:[#allocation6 + $0x5d8] sm:$0xff] }
  0x7a   :  { %2763 = vst [vmem:[#allocation158_spill] sm:$0xff] %v2117_v11  ;;  %2764 = vst [vmem:[#allocation159_spill] sm:$0xff] %v2119_v53  ;;  %v2123_v5 = vld [vmem:[#allocation6 + $0x5e0] sm:$0xff]  ;;  %v2125_v35 = vld [vmem:[#allocation6 + $0x5e8] sm:$0xff] }
  0x7b   :  { %2765 = vst [vmem:[#allocation160_spill] sm:$0xff] %v2121_v29  ;;  %2766 = vst [vmem:[#allocation161_spill] sm:$0xff] %v2123_v5  ;;  %v2127_v47 = vld [vmem:[#allocation6 + $0x5f0] sm:$0xff]  ;;  %v2129_v59 = vld [vmem:[#allocation6 + $0x5f8] sm:$0xff] }
  0x7c   :  { %2767 = vst [vmem:[#allocation162_spill] sm:$0xff] %v2125_v35  ;;  %2768 = vst [vmem:[#allocation163_spill] sm:$0xff] %v2127_v47  ;;  %v2134_v52 = vld [vmem:[%s2606_s6] sm:$0x3f]  ;;  %v70_v5 = vld [vmem:[%s2601_s1 + $0x8] sm:$0xff] }
  0x7d   :  { %2769 = vst [vmem:[#allocation164_spill] sm:$0xff] %v2129_v59  ;;  %2770 = vst [vmem:[#allocation165_spill] sm:$0xff] %v2134_v52  ;;  %v69_v11 = vld [vmem:[%s2601_s1] sm:$0xff]  ;;  %v71_v47 = vld [vmem:[%s2601_s1 + $0x10] sm:$0xff] }
  0x7e   :  { %v1299_v17 = vpack.c.bf16 %v70_v5, %v69_v11  ;;  %v72_v59 = vld [vmem:[%s2601_s1 + $0x18] sm:$0x7]  ;;  %v61_v52 = vld [vmem:[%s2600_s0] sm:$0xff]  ;;  %vm1304_vm3 = vmpackc.low %vm105_vm0, %vm1680_vm2 }
  0x7f   :  { %v1303_v35 = vpack.c.bf16 %v72_v59, %v71_v47  ;;  %1287 = vmatprep.mubr.msk.f32.mxu0 %vm80_vm1, %v61_v52  ;;  %v223_v5 = vld [vmem:[#allocation3 + $0x8] sm:$0xff]  ;;  %v229_v11 = vld [vmem:[#allocation3 + $0x38] sm:$0xff]  ;;  %v222_v53 = vld [vmem:[#allocation3] sm:$0xff] }
  0x80   :  { %1300 = vmatprep.subr.bf16.mxu0 %v1299_v17  ;;  %v1309_v10 = vpack.c.bf16 %v229_v11, %v223_v5  ;;  %v228_v29 = vld [vmem:[#allocation3 + $0x30] sm:$0xff]  ;;  %v62_v62 = vld [vmem:[%s2600_s0 + $0x8] sm:$0xff]  ;;  %v226_v22 = vld [vmem:[#allocation3 + $0x20] sm:$0xff] }
  0x81   :  { %1302 = vmatpush3.bf16.msra.mxu0 %v1299_v17  ;;  %v1311_v41 = vpack.c.bf16 %v228_v29, %v222_v53  ;;  %v63_v47 = vld [vmem:[%s2600_s0 + $0x10] sm:$0xff]  ;;  %v64_v17 = vld [vmem:[%s2600_s0 + $0x18] sm:$0xff]  ;;  %v65_v29 = vld [vmem:[%s2600_s0 + $0x20] sm:$0xff] }
  0x82   :  { %1305 = vmatprep.subr.msk.bf16.mxu0 %vm1304_vm3, %v1303_v35  ;;  %1525 = vmatprep.subr.bf16.mxu1 %v1309_v10  ;;  %v235_v52 = vld [vmem:[#allocation3 + $0x68] sm:$0xff]  ;;  %v241_v53 = vld [vmem:[#allocation3 + $0x98] sm:$0xff]  ;;  %v240_v5 = vld [vmem:[#allocation3 + $0x90] sm:$0xff] }
  0x83   :  { %1527 = vmatpush1.bf16.msra.mxu1 %v1311_v41  ;;  %v1313_v59 = vpack.c.bf16 %v241_v53, %v235_v52  ;;  %v2187_v53 = vld [vmem:[%s2602_s2] ss:$0 sm:$0xff]  ;;  %v232_v34 = vld [vmem:[#allocation3 + $0x50] sm:$0xff]  ;;  %v239_v50 = vld [vmem:[#allocation3 + $0x88] sm:$0xff] }
  0x84   :  { %v242_v58 = vld [vmem:[#allocation3 + $0xa0] sm:$0xff] }
  0x85   :  { %1308 = vmatpush3.bf16.msk.msra.mxu0 %vm1304_vm3, %v1303_v35  ;;  %v67_v35 = vld [vmem:[%s2600_s0 + $0x30] sm:$0xff]  ;;  %1526 = vmatprep.subr.bf16.mxu1 %v1313_v59  ;;  %v238_v60 = vld [vmem:[#allocation3 + $0x80] sm:$0xff] }
  0x86   :  { %1310 = vmatprep.subr.bf16.mxu0 %v1309_v10  ;;  %v66_v10 = vld [vmem:[%s2600_s0 + $0x28] sm:$0xff] }
  0x88   :  { %1288 = vmatmul.mubr.msk.f32.vlgmr.msra.gmra.mrb[0].mxu0 %vm80_vm1, %v62_v62  ;;  %v234_v62 = vld [vmem:[#allocation3 + $0x60] sm:$0xff] }
  0x89   :  { %1290 = vmatprep.mubr.msk.f32.mxu0 %vm80_vm1, %v63_v47  ;;  %1312 = vmatpush1.bf16.msra.mxu0 %v1311_v41  ;;  %v68_v41 = vld [vmem:[%s2600_s0 + $0x38] sm:$0xff]  ;;  %v1315_v11 = vpack.c.bf16 %v240_v5, %v234_v62  ;;  %v224_v62 = vld [vmem:[#allocation3 + $0x10] sm:$0xff]  ;;  %v230_v5 = vld [vmem:[#allocation3 + $0x40] sm:$0xff] }
  0x8a   :  { %1314 = vmatprep.subr.bf16.mxu0 %v1313_v59  ;;  %v225_v47 = vld [vmem:[#allocation3 + $0x18] sm:$0xff] }
  0x8b   :  { %1528 = vmatpush1.bf16.msra.mxu1 %v1315_v11 }
  0x8c   :  { %1291 = vmatmul.mubr.msk.f32.gmra.mrb[2].mxu0 %vm80_vm1, %v64_v17  ;;  %v231_v17 = vld [vmem:[#allocation3 + $0x48] sm:$0xff] }
  0x8d   :  { %1293 = vmatprep.mubr.msk.f32.mxu0 %vm80_vm1, %v65_v29  ;;  %1316 = vmatpush1.bf16.msra.mxu0 %v1315_v11  ;;  %v1317_v29 = vpack.c.bf16 %v231_v17, %v225_v47  ;;  %v237_v47 = vld [vmem:[#allocation3 + $0x78] sm:$0xff]  ;;  %v243_v17 = vld [vmem:[#allocation3 + $0xa8] sm:$0xff] }
  0x8f   :  { %1318 = vmatprep.subr.bf16.mxu0 %v1317_v29  ;;  %v236_v29 = vld [vmem:[#allocation3 + $0x70] sm:$0xff] }
  0x90   :  { %1294 = vmatmul.mubr.msk.f32.gmra.mrb[4].mxu0 %vm80_vm1, %v66_v10  ;;  %v2609_v10 = vmov 0.0  }
  0x91   :  { %1296 = vmatprep.mubr.msk.f32.mxu0 %vm80_vm1, %v67_v35  ;;  %59 = vst [vmem:[#allocation8] sm:$0xff] %v2609_v10  ;;  %60 = vst [vmem:[#allocation8 + $0x8] sm:$0xff] %v2609_v10  ;;  %379 = vmatprep.mubr.f32.mxu1 %v2609_v10  ;;  %v227_v35 = vld [vmem:[#allocation3 + $0x28] sm:$0xff] }
  0x94   :  { %1297 = vmatmul.mubr.msk.f32.gmra.mrb[6].mxu0 %vm80_vm1, %v68_v41  ;;  %v233_v41 = vld [vmem:[#allocation3 + $0x58] sm:$0xff] }
  0x95   :  { %367 = vmatprep.mubr.f32.mxu0 %v2609_v10  ;;  %v1325_v52 = vpack.c.bf16 %v233_v41, %v227_v35  ;;  %v1319_v10 = vpack.c.bf16 %v230_v5, %v224_v62  ;;  %v2771_v62 = vmov 0.0   ;;  %v1327_v5 = vpack.c.bf16 %v232_v34, %v226_v22 }
  0x97   :  { %1326 = vmatprep.subr.bf16.mxu1 %v1325_v52  ;;  %v1321_v52 = vpack.c.bf16 %v243_v17, %v237_v47 }
 0x15b   :  { %v1289_v59 = vpop.f32.mrb[0].mxu0 }
 0x15c   :  { %v175_v11 = vpop.f32.mrb[1].mxu0  ;;  %v181_v4 = vadd.f32 %v1289_v59, %v2187_v53  ;;  %v1323_v59 = vpack.c.bf16 %v242_v58, %v236_v29 }
 0x15d   :  { %v176_v23 = vadd.f32 %v2187_v53, %v175_v11  ;;  %v245_v11 = vld [vmem:[#allocation3 + $0xb8] sm:$0xff] }
 0x15e   :  { %v1329_v46 = vpack.c.bf16 %v245_v11, %v239_v50 }
 0x15f   :  { %v2191_v35 = vmax.f32 %v176_v23, 0.0  ;;  %v1292_v41 = vpop.f32.mrb[2].mxu0  ;;  %v215_v23 = vmax.f32 %v181_v4, 0.0 }
 0x160   :  { %v185_v63 = vpop.f32.mrb[3].mxu0  ;;  %v191_v16 = vadd.f32 %v1292_v41, %v2187_v53 }
 0x161   :  { %v186_v56 = vadd.f32 %v2187_v53, %v185_v63  ;;  %1236 = vmatmul.mubr.msk.f32.vlgmr.msra.gmra.mrb[8].mxu0 %vm278_vm4, %v2191_v35  ;;  %v244_v63 = vld [vmem:[#allocation3 + $0xb0] sm:$0xff] }
 0x162   :  { %1320 = vmatpush1.bf16.msra.mxu0 %v1319_v10  ;;  %373 = vmatprep.mubr.f32.mxu0 %v2771_v62  ;;  %v217_v22 = vmax.f32 %v191_v16, 0.0  ;;  %v1331_v34 = vpack.c.bf16 %v244_v63, %v238_v60 }
 0x163   :  { %v216_v47 = vmax.f32 %v186_v56, 0.0  ;;  %1322 = vmatprep.subr.bf16.mxu0 %v1321_v52  ;;  %v1295_v17 = vpop.f32.mrb[4].mxu0  ;;  %v2254_v52 = vld [vmem:[%s2605_s5] sm:$0x3f]  ;;  %s2343_s5 = smov 0  }
 0x164   :  { %v195_v28 = vpop.f32.mrb[5].mxu0  ;;  %v201_v16 = vadd.f32 %v1295_v17, %v2187_v53 }
 0x165   :  { %1237 = vmatmul.mubr.msk.f32.gmra.mrb[10].mxu0 %vm278_vm4, %v215_v23  ;;  %1238 = vmatmul.mubr.msk.f32.vlgmr.msra.gmra.mrb[0].mxu1 %vm278_vm4, %v216_v47  ;;  %v196_v10 = vadd.f32 %v2187_v53, %v195_v28 }
 0x166   :  { %1328 = vmatpush1.bf16.msra.mxu1 %v1327_v5  ;;  %1324 = vmatpush1.bf16.msra.mxu0 %v1323_v59 }
 0x167   :  { %385 = vmatprep.mubr.f32.mxu1 %v2771_v62  ;;  %480 = vmatprep.mubr.f32.mxu0 %v2771_v62  ;;  %v1298_v4 = vpop.f32.mrb[6].mxu0  ;;  %v218_v50 = vmax.f32 %v196_v10, 0.0 }
 0x168   :  { %v205_v56 = vpop.f32.mrb[7].mxu0  ;;  %1330 = vmatprep.subr.bf16.mxu1 %v1329_v46  ;;  %v219_v46 = vmax.f32 %v201_v16, 0.0  ;;  %v211_v60 = vadd.f32 %v1298_v4, %v2187_v53 }
 0x169   :  { %1239 = vmatmul.mubr.msk.f32.gmra.mrb[2].mxu1 %vm278_vm4, %v217_v22  ;;  %1244 = vmatmul.mubr.msk.f32.vlgmr.msra.gmra.mrb[12].mxu0 %vm278_vm4, %v2191_v35  ;;  %v206_v28 = vadd.f32 %v2187_v53, %v205_v56  ;;  %v248_v53 = vlaneseq }
 0x16a   :  { %391 = vmatprep.mubr.f32.mxu1 %v2771_v62  ;;  %486 = vmatprep.mubr.f32.mxu0 %v2771_v62  ;;  %v221_v29 = vmax.f32 %v211_v60, 0.0 }
 0x16b   :  { %1332 = vmatpush1.bf16.msra.mxu1 %v1331_v34  ;;  %v220_v58 = vmax.f32 %v206_v28, 0.0 }
 0x16d   :  { %1240 = vmatmul.mubr.msk.f32.gmra.mrb[4].mxu1 %vm278_vm4, %v218_v50  ;;  %1245 = vmatmul.mubr.msk.f32.gmra.mrb[14].mxu0 %vm278_vm4, %v215_v23 }
 0x16e   :  { %397 = vmatprep.mubr.f32.mxu1 %v2771_v62  ;;  %492 = vmatprep.mubr.f32.mxu0 %v2771_v62 }
 0x171   :  { %1241 = vmatmul.mubr.msk.f32.gmra.mrb[6].mxu1 %vm278_vm4, %v219_v46  ;;  %1246 = vmatmul.mubr.msk.f32.gmra.mrb[16].mxu0 %vm278_vm4, %v216_v47 }
 0x172   :  { %403 = vmatprep.mubr.f32.mxu1 %v2771_v62  ;;  %498 = vmatprep.mubr.f32.mxu0 %v2771_v62 }
 0x175   :  { %1242 = vmatmul.mubr.msk.f32.gmra.mrb[8].mxu1 %vm278_vm4, %v220_v58  ;;  %1247 = vmatmul.mubr.msk.f32.gmra.mrb[18].mxu0 %vm278_vm4, %v217_v22 }
 0x176   :  { %409 = vmatprep.mubr.f32.mxu1 %v2771_v62  ;;  %504 = vmatprep.mubr.f32.mxu0 %v2771_v62 }
 0x179   :  { %1243 = vmatmul.mubr.msk.f32.gmra.mrb[10].mxu1 %vm278_vm4, %v221_v29  ;;  %1248 = vmatmul.mubr.msk.f32.gmra.mrb[20].mxu0 %vm278_vm4, %v218_v50 }
 0x17a   :  { %510 = vmatprep.mubr.f32.mxu0 %v2771_v62  ;;  %593 = vmatprep.mubr.f32.mxu1 %v2771_v62 }
 0x17d   :  { %1249 = vmatmul.mubr.msk.f32.gmra.mrb[22].mxu0 %vm278_vm4, %v219_v46  ;;  %1252 = vmatmul.mubr.msk.f32.vlgmr.msra.gmra.mrb[12].mxu1 %vm278_vm4, %v2191_v35  ;;  %v2248_v35 = vshrl.u32 %v248_v53, 7 }
 0x17e   :  { %516 = vmatprep.mubr.f32.mxu0 %v2771_v62  ;;  %599 = vmatprep.mubr.f32.mxu1 %v2771_v62 }
 0x17f   :  { %v2616_v41 = vsub.s32 0, %v2248_v35  ;;  %v2615_v11 = vsub.s32 1, %v2248_v35  ;;  %v2614_v17 = vsub.s32 2, %v2248_v35  ;;  %v2613_v10 = vsub.s32 3, %v2248_v35 }
 0x181   :  { %1250 = vmatmul.mubr.msk.f32.gmra.mrb[24].mxu0 %vm278_vm4, %v220_v58  ;;  %1253 = vmatmul.mubr.msk.f32.gmra.mrb[14].mxu1 %vm278_vm4, %v215_v23  ;;  %v2260_v5 = vrot.slane %v2254_v52, %v2616_v41  ;;  %v2276_v28 = vrot.slane %v2254_v52, %v2614_v17  ;;  %v2283_v60 = vrot.slane %v2254_v52, %v2613_v10 }
 0x182   :  { %522 = vmatprep.mubr.f32.mxu0 %v2771_v62  ;;  %605 = vmatprep.mubr.f32.mxu1 %v2771_v62 }
 0x185   :  { %1251 = vmatmul.mubr.msk.f32.gmra.mrb[26].mxu0 %vm278_vm4, %v221_v29  ;;  %1254 = vmatmul.mubr.msk.f32.gmra.mrb[16].mxu1 %vm278_vm4, %v216_v47 }
 0x186   :  { %611 = vmatprep.mubr.f32.mxu1 %v2771_v62 }
 0x189   :  { %1255 = vmatmul.mubr.msk.f32.gmra.mrb[18].mxu1 %vm278_vm4, %v217_v22 }
 0x18a   :  { %617 = vmatprep.mubr.f32.mxu1 %v2771_v62 }
 0x18d   :  { %1256 = vmatmul.mubr.msk.f32.gmra.mrb[20].mxu1 %vm278_vm4, %v218_v50 }
 0x18e   :  { %623 = vmatprep.mubr.f32.mxu1 %v2771_v62 }
 0x191   :  { %1257 = vmatmul.mubr.msk.f32.gmra.mrb[22].mxu1 %vm278_vm4, %v219_v46 }
 0x192   :  { %629 = vmatprep.mubr.f32.mxu1 %v2771_v62 }
 0x195   :  { %1258 = vmatmul.mubr.msk.f32.gmra.mrb[24].mxu1 %vm278_vm4, %v220_v58 }
 0x196   :  { %635 = vmatprep.mubr.f32.mxu1 %v2771_v62  ;;  %v2265_v62 = vrot.slane %v2254_v52, %v2615_v11 }
 0x199   :  { %1259 = vmatmul.mubr.msk.f32.gmra.mrb[26].mxu1 %vm278_vm4, %v221_v29 }
 0x234   :  { %v369_v59 = vpop.f32.mrb[8].mxu0 }
 0x235   :  { %v370_v23 = vadd.f32 %v369_v59, %v2260_v5  ;;  %v371_v47 = vpop.f32.mrb[9].mxu0 }
 0x236   :  { %v372_v63 = vadd.f32 %v371_v47, %v2265_v62 }
 0x237   :  { %642 = vst [vmem:[#allocation2] sm:$0xff] %v370_v23 }
 0x238   :  { %643 = vst [vmem:[#allocation2 + $0x8] sm:$0xff] %v372_v63  ;;  %v375_v22 = vpop.f32.mrb[10].mxu0  ;;  %v381_v4 = vpop.f32.mrb[0].mxu1 }
 0x239   :  { %v376_v34 = vadd.f32 %v375_v22, %v2260_v5  ;;  %v382_v56 = vadd.f32 %v381_v4, %v2260_v5  ;;  %v377_v50 = vpop.f32.mrb[11].mxu0  ;;  %v383_v16 = vpop.f32.mrb[1].mxu1 }
 0x23a   :  { %v378_v46 = vadd.f32 %v377_v50, %v2265_v62  ;;  %v384_v58 = vadd.f32 %v383_v16, %v2265_v62 }
 0x23b   :  { %648 = vst [vmem:[#allocation2 + $0x30] sm:$0xff] %v376_v34  ;;  %654 = vst [vmem:[#allocation2 + $0x60] sm:$0xff] %v382_v56 }
 0x23c   :  { %649 = vst [vmem:[#allocation2 + $0x38] sm:$0xff] %v378_v46  ;;  %655 = vst [vmem:[#allocation2 + $0x68] sm:$0xff] %v384_v58  ;;  %v387_v29 = vpop.f32.mrb[2].mxu1  ;;  %v482_v53 = vpop.f32.mrb[12].mxu0 }
 0x23d   :  { %v388_v59 = vadd.f32 %v387_v29, %v2260_v5  ;;  %v483_v23 = vadd.f32 %v482_v53, %v2276_v28  ;;  %v389_v47 = vpop.f32.mrb[3].mxu1  ;;  %v484_v63 = vpop.f32.mrb[13].mxu0 }
 0x23e   :  { %v390_v22 = vadd.f32 %v389_v47, %v2265_v62  ;;  %v485_v4 = vadd.f32 %v484_v63, %v2283_v60 }
 0x23f   :  { %660 = vst [vmem:[#allocation2 + $0x90] sm:$0xff] %v388_v59  ;;  %644 = vst [vmem:[#allocation2 + $0x10] sm:$0xff] %v483_v23 }
 0x240   :  { %661 = vst [vmem:[#allocation2 + $0x98] sm:$0xff] %v390_v22  ;;  %645 = vst [vmem:[#allocation2 + $0x18] sm:$0xff] %v485_v4  ;;  %v393_v34 = vpop.f32.mrb[4].mxu1  ;;  %v488_v56 = vpop.f32.mrb[14].mxu0 }
 0x241   :  { %v394_v50 = vadd.f32 %v393_v34, %v2260_v5  ;;  %v489_v16 = vadd.f32 %v488_v56, %v2276_v28  ;;  %v395_v46 = vpop.f32.mrb[5].mxu1  ;;  %v490_v58 = vpop.f32.mrb[15].mxu0 }
 0x242   :  { %v396_v29 = vadd.f32 %v395_v46, %v2265_v62  ;;  %v491_v53 = vadd.f32 %v490_v58, %v2283_v60 }
 0x243   :  { %666 = vst [vmem:[#allocation2 + $0xc0] sm:$0xff] %v394_v50  ;;  %650 = vst [vmem:[#allocation2 + $0x40] sm:$0xff] %v489_v16 }
 0x244   :  { %667 = vst [vmem:[#allocation2 + $0xc8] sm:$0xff] %v396_v29  ;;  %651 = vst [vmem:[#allocation2 + $0x48] sm:$0xff] %v491_v53  ;;  %v399_v59 = vpop.f32.mrb[6].mxu1  ;;  %v494_v23 = vpop.f32.mrb[16].mxu0 }
 0x245   :  { %v400_v47 = vadd.f32 %v399_v59, %v2260_v5  ;;  %v495_v63 = vadd.f32 %v494_v23, %v2276_v28  ;;  %v401_v22 = vpop.f32.mrb[7].mxu1  ;;  %v496_v4 = vpop.f32.mrb[17].mxu0  ;;  %v2611_v59 = vsub.s32 4, %v2248_v35 }
 0x246   :  { %v402_v34 = vadd.f32 %v401_v22, %v2265_v62  ;;  %v497_v56 = vadd.f32 %v496_v4, %v2283_v60  ;;  %v2612_v4 = vsub.s32 5, %v2248_v35 }
 0x247   :  { %672 = vst [vmem:[#allocation2 + $0xf0] sm:$0xff] %v400_v47  ;;  %656 = vst [vmem:[#allocation2 + $0x70] sm:$0xff] %v495_v63 }
 0x248   :  { %673 = vst [vmem:[#allocation2 + $0xf8] sm:$0xff] %v402_v34  ;;  %657 = vst [vmem:[#allocation2 + $0x78] sm:$0xff] %v497_v56  ;;  %v405_v50 = vpop.f32.mrb[8].mxu1  ;;  %v500_v16 = vpop.f32.mrb[18].mxu0 }
 0x249   :  { %v406_v46 = vadd.f32 %v405_v50, %v2260_v5  ;;  %v501_v58 = vadd.f32 %v500_v16, %v2276_v28  ;;  %v407_v29 = vpop.f32.mrb[9].mxu1  ;;  %v502_v53 = vpop.f32.mrb[19].mxu0 }
 0x24a   :  { %v408_v23 = vadd.f32 %v407_v29, %v2265_v62  ;;  %v503_v22 = vadd.f32 %v502_v53, %v2283_v60  ;;  %v2308_v29 = vrot.slane %v2254_v52, %v2611_v59 }
 0x24b   :  { %678 = vst [vmem:[#allocation2 + $0x120] sm:$0xff] %v406_v46  ;;  %662 = vst [vmem:[#allocation2 + $0xa0] sm:$0xff] %v501_v58  ;;  %v2315_v58 = vrot.slane %v2254_v52, %v2612_v4 }
 0x24c   :  { %679 = vst [vmem:[#allocation2 + $0x128] sm:$0xff] %v408_v23  ;;  %663 = vst [vmem:[#allocation2 + $0xa8] sm:$0xff] %v503_v22  ;;  %v411_v47 = vpop.f32.mrb[10].mxu1  ;;  %v506_v63 = vpop.f32.mrb[20].mxu0 }
 0x24d   :  { %v412_v34 = vadd.f32 %v411_v47, %v2260_v5  ;;  %v507_v56 = vadd.f32 %v506_v63, %v2276_v28  ;;  %v413_v50 = vpop.f32.mrb[11].mxu1  ;;  %v508_v16 = vpop.f32.mrb[21].mxu0 }
 0x24e   :  { %v414_v53 = vadd.f32 %v413_v50, %v2265_v62  ;;  %v509_v46 = vadd.f32 %v508_v16, %v2283_v60 }
 0x24f   :  { %684 = vst [vmem:[#allocation2 + $0x150] sm:$0xff] %v412_v34  ;;  %668 = vst [vmem:[#allocation2 + $0xd0] sm:$0xff] %v507_v56 }
 0x250   :  { %685 = vst [vmem:[#allocation2 + $0x158] sm:$0xff] %v414_v53  ;;  %669 = vst [vmem:[#allocation2 + $0xd8] sm:$0xff] %v509_v46  ;;  %v512_v5 = vpop.f32.mrb[22].mxu0  ;;  %v595_v23 = vpop.f32.mrb[12].mxu1 }
 0x251   :  { %v513_v22 = vadd.f32 %v512_v5, %v2276_v28  ;;  %v596_v47 = vadd.f32 %v595_v23, %v2308_v29  ;;  %v514_v63 = vpop.f32.mrb[23].mxu0  ;;  %v597_v59 = vpop.f32.mrb[13].mxu1 }
 0x252   :  { %v515_v62 = vadd.f32 %v514_v63, %v2283_v60  ;;  %v598_v50 = vadd.f32 %v597_v59, %v2315_v58 }
 0x253   :  { %674 = vst [vmem:[#allocation2 + $0x100] sm:$0xff] %v513_v22  ;;  %646 = vst [vmem:[#allocation2 + $0x20] sm:$0xff] %v596_v47 }
 0x254   :  { %675 = vst [vmem:[#allocation2 + $0x108] sm:$0xff] %v515_v62  ;;  %647 = vst [vmem:[#allocation2 + $0x28] sm:$0xff] %v598_v50  ;;  %v518_v52 = vpop.f32.mrb[24].mxu0  ;;  %v601_v34 = vpop.f32.mrb[14].mxu1 }
 0x255   :  { %v519_v56 = vadd.f32 %v518_v52, %v2276_v28  ;;  %v602_v16 = vadd.f32 %v601_v34, %v2308_v29  ;;  %v520_v53 = vpop.f32.mrb[25].mxu0  ;;  %v603_v46 = vpop.f32.mrb[15].mxu1 }
 0x256   :  { %v521_v5 = vadd.f32 %v520_v53, %v2283_v60  ;;  %v604_v23 = vadd.f32 %v603_v46, %v2315_v58 }
 0x257   :  { %680 = vst [vmem:[#allocation2 + $0x130] sm:$0xff] %v519_v56  ;;  %652 = vst [vmem:[#allocation2 + $0x50] sm:$0xff] %v602_v16 }
 0x258   :  { %681 = vst [vmem:[#allocation2 + $0x138] sm:$0xff] %v521_v5  ;;  %653 = vst [vmem:[#allocation2 + $0x58] sm:$0xff] %v604_v23  ;;  %v524_v59 = vpop.f32.mrb[26].mxu0  ;;  %v607_v22 = vpop.f32.mrb[16].mxu1 }
 0x259   :  { %v525_v47 = vadd.f32 %v524_v59, %v2276_v28  ;;  %v608_v63 = vadd.f32 %v607_v22, %v2308_v29  ;;  %v526_v62 = vpop.f32.mrb[27].mxu0  ;;  %v609_v50 = vpop.f32.mrb[17].mxu1 }
 0x25a   :  { %v527_v52 = vadd.f32 %v526_v62, %v2283_v60  ;;  %v610_v34 = vadd.f32 %v609_v50, %v2315_v58 }
 0x25b   :  { %686 = vst [vmem:[#allocation2 + $0x160] sm:$0xff] %v525_v47  ;;  %658 = vst [vmem:[#allocation2 + $0x80] sm:$0xff] %v608_v63 }
 0x25c   :  { %687 = vst [vmem:[#allocation2 + $0x168] sm:$0xff] %v527_v52  ;;  %659 = vst [vmem:[#allocation2 + $0x88] sm:$0xff] %v610_v34  ;;  %v613_v56 = vpop.f32.mrb[18].mxu1 }
 0x25d   :  { %v614_v16 = vadd.f32 %v613_v56, %v2308_v29  ;;  %v615_v53 = vpop.f32.mrb[19].mxu1 }
 0x25e   :  { %v616_v46 = vadd.f32 %v615_v53, %v2315_v58 }
 0x25f   :  { %664 = vst [vmem:[#allocation2 + $0xb0] sm:$0xff] %v614_v16 }
 0x260   :  { %665 = vst [vmem:[#allocation2 + $0xb8] sm:$0xff] %v616_v46  ;;  %v619_v28 = vpop.f32.mrb[20].mxu1 }
 0x261   :  { %v620_v5 = vadd.f32 %v619_v28, %v2308_v29  ;;  %v621_v23 = vpop.f32.mrb[21].mxu1  ;;  %v2339_v28 = vmov 0.0  }
 0x262   :  { %v622_v60 = vadd.f32 %v621_v23, %v2315_v58 }
 0x263   :  { %670 = vst [vmem:[#allocation2 + $0xe0] sm:$0xff] %v620_v5  ;;  %v2341_v5 = vmov 0.0  }
 0x264   :  { %671 = vst [vmem:[#allocation2 + $0xe8] sm:$0xff] %v622_v60  ;;  %v625_v59 = vpop.f32.mrb[22].mxu1 }
 0x265   :  { %v626_v22 = vadd.f32 %v625_v59, %v2308_v29  ;;  %v627_v47 = vpop.f32.mrb[23].mxu1 }
 0x266   :  { %v628_v63 = vadd.f32 %v627_v47, %v2315_v58 }
 0x267   :  { %676 = vst [vmem:[#allocation2 + $0x110] sm:$0xff] %v626_v22 }
 0x268   :  { %677 = vst [vmem:[#allocation2 + $0x118] sm:$0xff] %v628_v63  ;;  %v631_v62 = vpop.f32.mrb[24].mxu1 }
 0x269   :  { %v632_v50 = vadd.f32 %v631_v62, %v2308_v29  ;;  %v633_v52 = vpop.f32.mrb[25].mxu1 }
 0x26a   :  { %v634_v34 = vadd.f32 %v633_v52, %v2315_v58 }
 0x26b   :  { %682 = vst [vmem:[#allocation2 + $0x140] sm:$0xff] %v632_v50 }
 0x26c   :  { %683 = vst [vmem:[#allocation2 + $0x148] sm:$0xff] %v634_v34  ;;  %v637_v56 = vpop.f32.mrb[26].mxu1 }
 0x26d   :  { %v638_v16 = vadd.f32 %v637_v56, %v2308_v29  ;;  %v639_v53 = vpop.f32.mrb[27].mxu1 }
 0x26e   :  { %v640_v46 = vadd.f32 %v639_v53, %v2315_v58 }
 0x26f   :  { %688 = vst [vmem:[#allocation2 + $0x170] sm:$0xff] %v638_v16 }
 0x270   :  { %689 = vst [vmem:[#allocation2 + $0x178] sm:$0xff] %v640_v46 }
 0x271 LB: > { %v1333_v29 = vpack.c.bf16 %v1761_v7, %v1749_v1  ;;  %v2772_v0 = vld [vmem:[#allocation12_spill] sm:$0xff]  ;;  %v1337_v23 = vpack.c.bf16 %v1785_v19, %v1773_v13  ;;  %v1339_v60 = vpack.c.bf16 %v1783_v18, %v1771_v12  ;;  %v1341_v59 = vpack.c.bf16 %v1809_v31, %v1797_v25  ;;  %1004 = vmatprep.mubr.f32.mxu0 %v1666_v28  ;;  %v2782_v10 = vld [vmem:[#allocation51_spill] sm:$0xff]  ;;  %v2794_v11 = vld [vmem:[#allocation53_spill] sm:$0xff]  ;;  %s1260_s26 = sshll.u32 %s1674_s5, 3  ;;  %s892_s5 = sadd.s32 1, %s1674_s5   ;;  %s1674_s5 = sphi %s2343_s5, %s892_s5   ;;  %v1670_v5 = vphi %v2341_v5, %v2933_v5   ;;  %v1666_v28 = vphi %v2339_v28, %v2932_v28  }
 0x272   : > { %v1335_v58 = vpack.c.bf16 %v1759_v6, %v2772_v0  ;;  %v1397_v22 = vpack.c.bf16 %v1765_v9, %v1753_v3  ;;  %v1399_v47 = vpack.c.bf16 %v1763_v8, %v1751_v2  ;;  %v1343_v63 = vpack.c.bf16 %v1807_v30, %v1795_v24  ;;  %1075 = vmatprep.mubr.f32.mxu1 %v1666_v28  ;;  %s898_s27 = sshra.s32 %s1260_s26, 3  ;;  %p891_p2 = scmp.ge.s32.totalorder %s892_s5, 8 }
 0x273   : > { %1334 = vmatprep.subr.bf16.mxu0 %v1333_v29  ;;  %v1401_v62 = vpack.c.bf16 %v1789_v21, %v1777_v15  ;;  %v1345_v50 = vpack.c.bf16 %v1833_v43, %v1821_v37  ;;  %v1403_v52 = vpack.c.bf16 %v1787_v20, %v1775_v14  ;;  %v1405_v34 = vpack.c.bf16 %v1813_v33, %v1801_v27  ;;  %s1266_s28 = smul.u32 48, %s898_s27  ;;  %s1682_s30 = smov (%p891_p2), [#allocation8]  }
 0x274   : > { %1336 = vmatpush1.bf16.msra.mxu0 %v1335_v58  ;;  %1398 = vmatprep.subr.bf16.mxu1 %v1397_v22  ;;  %v1347_v56 = vpack.c.bf16 %v1831_v42, %v1819_v36  ;;  %v1349_v16 = vpack.c.bf16 %v1857_v55, %v1845_v49  ;;  %v1407_v53 = vpack.c.bf16 %v1811_v32, %v1799_v26  ;;  %v2774_v22 = vld [vmem:[#allocation40_spill] sm:$0xff]  ;;  %v2925_v41 = vsub.s32 0, %v2248_v35  ;;  %s1203_s8 = sshll.u32 (%p891_p2), %s1682_s30, 4  ;;  %s1204_s8 = int_to_ptr.vmem [resolvable:$true] %s1203_s8 }
 0x275   : > { %1338 = vmatprep.subr.bf16.mxu0 %v1337_v23  ;;  %1400 = vmatpush1.bf16.msra.mxu1 %v1399_v47  ;;  %v1409_v46 = vpack.c.bf16 %v1837_v45, %v1825_v39  ;;  %v1351_v29 = vpack.c.bf16 %v1855_v54, %v1843_v48  ;;  %v1353_v58 = vpack.c.bf16 %v1881_v40, %v1869_v61  ;;  %s2559_s29 = scalar_lea.vmem [#allocation2], %s1266_s28  ;;  %s1624_s9 = scalar_lea.vmem (%p891_p2), %s1204_s8, 256 }
 0x276   : > { %1402 = vmatprep.subr.bf16.mxu1 %v1401_v62  ;;  %v1411_v23 = vpack.c.bf16 %v1835_v44, %v1823_v38  ;;  %v2776_v62 = vld [vmem:[#allocation52_spill] sm:$0xff]  ;;  %p1625_p3 = scmp.ne.s32.totalorder (%p891_p2), %s1204_s8, %s1624_s9  ;;  %p1629_p4 = scmp.lt.s32.totalorder (%p891_p2), %s1204_s8, %s1204_s8 }
 0x277   :  { %p1630_p5 = scmp.lt.s32.totalorder (%p891_p2), %s1624_s9, %s1624_s9 }
 0x278   : > { %1340 = vmatpush1.bf16.msra.mxu0 %v1339_v60  ;;  %v1413_v60 = vpack.c.bf16 %v1861_v57, %v1849_v51 }
 0x279   : > { %1342 = vmatprep.subr.bf16.mxu0 %v1341_v59  ;;  %1404 = vmatpush1.bf16.msra.mxu1 %v1403_v52  ;;  %v2773_v59 = vld [vmem:[#allocation35_spill] sm:$0xff]  ;;  %v2777_v52 = vld [vmem:[#allocation29_spill] sm:$0xff]  ;;  %p1631_p6 = por (%p891_p2), %p1630_p5, %p1629_p4 }
 0x27a   : > { %1406 = vmatprep.subr.bf16.mxu1 %v1405_v34  ;;  %v1355_v47 = vpack.c.bf16 %v2774_v22, %v2773_v59  ;;  %v2778_v34 = vld [vmem:[#allocation32_spill] sm:$0xff] }
 0x27b   : > { %v2785_v22 = vld [vmem:[#allocation36_spill] sm:$0xff]  ;;  %p1632_p7 = pnand (%p891_p2), %p1631_p6, %p1625_p3 }
 0x27c   : > { %1344 = vmatpush1.bf16.msra.mxu0 %v1343_v63  ;;  %v2775_v63 = vld [vmem:[#allocation46_spill] sm:$0xff] }
 0x27d   : > { %1346 = vmatprep.subr.bf16.mxu0 %v1345_v50  ;;  %1408 = vmatpush1.bf16.msra.mxu1 %v1407_v53  ;;  %v1357_v50 = vpack.c.bf16 %v2776_v62, %v2775_v63  ;;  %v2780_v53 = vld [vmem:[#allocation42_spill] sm:$0xff]  ;;  %v2787_v62 = vld [vmem:[#allocation48_spill] sm:$0xff] }
 0x27e   : > { %1410 = vmatprep.subr.bf16.mxu1 %v1409_v46  ;;  %v2781_v46 = vld [vmem:[#allocation45_spill] sm:$0xff] }
 0x27f   : > { %v1359_v17 = vpack.c.bf16 %v2782_v10, %v2781_v46  ;;  %v2791_v10 = vld [vmem:[#allocation70_spill] sm:$0xff] }
 0x280   : > { %1348 = vmatpush1.bf16.msra.mxu0 %v1347_v56  ;;  %v1415_v56 = vpack.c.bf16 %v2778_v34, %v2777_v52  ;;  %v2789_v34 = vld [vmem:[#allocation57_spill] sm:$0xff] }
 0x281   : > { %1350 = vmatprep.subr.bf16.mxu0 %v1349_v16  ;;  %1412 = vmatpush1.bf16.msra.mxu1 %v1411_v23  ;;  %v2779_v16 = vld [vmem:[#allocation37_spill] sm:$0xff] }
 0x282   : > { %1414 = vmatprep.subr.bf16.mxu1 %v1413_v60  ;;  %v1417_v4 = vpack.c.bf16 %v2780_v53, %v2779_v16  ;;  %v2786_v23 = vld [vmem:[#allocation41_spill] sm:$0xff]  ;;  %v2788_v60 = vld [vmem:[#allocation54_spill] sm:$0xff]  ;;  %v2792_v53 = vld [vmem:[#allocation76_spill] sm:$0xff] }
 0x283   : > { %v1419_v63 = vpack.c.bf16 %v2786_v23, %v2785_v22  ;;  %v1421_v52 = vpack.c.bf16 %v2788_v60, %v2787_v62  ;;  %v1365_v46 = vpack.c.bf16 %v2792_v53, %v2791_v10  ;;  %v2798_v23 = vld [vmem:[#allocation75_spill] sm:$0xff]  ;;  %v2800_v60 = vld [vmem:[#allocation88_spill] sm:$0xff]  ;;  %v2804_v53 = vld [vmem:[#allocation78_spill] sm:$0xff] }
 0x284   : > { %1352 = vmatpush1.bf16.msra.mxu0 %v1351_v29  ;;  %v2783_v29 = vld [vmem:[#allocation58_spill] sm:$0xff] }
 0x285   : > { %1354 = vmatprep.subr.bf16.mxu0 %v1353_v58  ;;  %v2784_v58 = vld [vmem:[#allocation64_spill] sm:$0xff]  ;;  %1416 = vmatpush1.bf16.msra.mxu1 %v1415_v56 }
 0x286   : > { %v1361_v59 = vpack.c.bf16 %v2784_v58, %v2783_v29  ;;  %1418 = vmatprep.subr.bf16.mxu1 %v1417_v4  ;;  %v2795_v56 = vld [vmem:[#allocation60_spill] sm:$0xff]  ;;  %v2796_v58 = vld [vmem:[#allocation66_spill] sm:$0xff]  ;;  %v2797_v4 = vld [vmem:[#allocation69_spill] sm:$0xff] }
 0x287   : > { %v1425_v22 = vpack.c.bf16 %v2796_v58, %v2795_v56  ;;  %v1367_v62 = vpack.c.bf16 %v2798_v23, %v2797_v4  ;;  %v2808_v58 = vld [vmem:[#allocation100_spill] sm:$0xff]  ;;  %v2810_v23 = vld [vmem:[#allocation77_spill] sm:$0xff] }
 0x288   : > { %1356 = vmatpush1.bf16.msra.mxu0 %v1355_v47  ;;  %v2790_v47 = vld [vmem:[#allocation63_spill] sm:$0xff] }
 0x289   : > { %1358 = vmatprep.subr.bf16.mxu0 %v1357_v50  ;;  %v1363_v16 = vpack.c.bf16 %v2790_v47, %v2789_v34  ;;  %1420 = vmatpush1.bf16.msra.mxu1 %v1419_v63  ;;  %v2793_v50 = vld [vmem:[#allocation47_spill] sm:$0xff]  ;;  %v2802_v47 = vld [vmem:[#allocation65_spill] sm:$0xff]  ;;  %v2803_v63 = vld [vmem:[#allocation72_spill] sm:$0xff] }
 0x28a   : > { %v1423_v29 = vpack.c.bf16 %v2794_v11, %v2793_v50  ;;  %1422 = vmatprep.subr.bf16.mxu1 %v1421_v52  ;;  %v1429_v11 = vpack.c.bf16 %v2804_v53, %v2803_v63  ;;  %v2805_v52 = vld [vmem:[#allocation81_spill] sm:$0xff]  ;;  %v2806_v50 = vld [vmem:[#allocation87_spill] sm:$0xff]  ;;  %v2816_v53 = vld [vmem:[#allocation112_spill] sm:$0xff] }
 0x28b   : > { %v1371_v56 = vpack.c.bf16 %v2806_v50, %v2805_v52  ;;  %v2818_v50 = vld [vmem:[#allocation89_spill] sm:$0xff] }
 0x28c   : > { %1360 = vmatpush1.bf16.msra.mxu0 %v1359_v17  ;;  %v2799_v17 = vld [vmem:[#allocation82_spill] sm:$0xff] }
 0x28d   : > { %1362 = vmatprep.subr.bf16.mxu0 %v1361_v59  ;;  %v1369_v34 = vpack.c.bf16 %v2800_v60, %v2799_v17  ;;  %1424 = vmatpush1.bf16.msra.mxu1 %v1423_v29  ;;  %v2801_v59 = vld [vmem:[#allocation59_spill] sm:$0xff]  ;;  %v2811_v29 = vld [vmem:[#allocation84_spill] sm:$0xff]  ;;  %v2812_v60 = vld [vmem:[#allocation90_spill] sm:$0xff] }
 0x28e   : > { %v1427_v10 = vpack.c.bf16 %v2802_v47, %v2801_v59  ;;  %1426 = vmatprep.subr.bf16.mxu1 %v1425_v22  ;;  %v1433_v59 = vpack.c.bf16 %v2812_v60, %v2811_v29  ;;  %v2813_v22 = vld [vmem:[#allocation93_spill] sm:$0xff]  ;;  %v2814_v47 = vld [vmem:[#allocation99_spill] sm:$0xff]  ;;  %v2824_v60 = vld [vmem:[#allocation124_spill] sm:$0xff] }
 0x28f   : > { %v1375_v63 = vpack.c.bf16 %v2814_v47, %v2813_v22  ;;  %v2826_v47 = vld [vmem:[#allocation101_spill] sm:$0xff] }
 0x290   : > { %1364 = vmatpush1.bf16.msra.mxu0 %v1363_v16  ;;  %v2807_v16 = vld [vmem:[#allocation94_spill] sm:$0xff] }
 0x291   : > { %1366 = vmatprep.subr.bf16.mxu0 %v1365_v46  ;;  %v1373_v4 = vpack.c.bf16 %v2808_v58, %v2807_v16  ;;  %1428 = vmatpush1.bf16.msra.mxu1 %v1427_v10  ;;  %v2809_v46 = vld [vmem:[#allocation71_spill] sm:$0xff]  ;;  %v2819_v10 = vld [vmem:[#allocation96_spill] sm:$0xff]  ;;  %v2820_v58 = vld [vmem:[#allocation102_spill] sm:$0xff] }
 0x292   : > { %v1431_v17 = vpack.c.bf16 %v2810_v23, %v2809_v46  ;;  %1430 = vmatprep.subr.bf16.mxu1 %v1429_v11  ;;  %v1437_v46 = vpack.c.bf16 %v2820_v58, %v2819_v10  ;;  %v2821_v11 = vld [vmem:[#allocation105_spill] sm:$0xff]  ;;  %v2822_v23 = vld [vmem:[#allocation111_spill] sm:$0xff]  ;;  %v2832_v58 = vld [vmem:[#allocation136_spill] sm:$0xff] }
 0x293   : > { %v1379_v29 = vpack.c.bf16 %v2822_v23, %v2821_v11  ;;  %v2834_v23 = vld [vmem:[#allocation113_spill] sm:$0xff] }
 0x294   : > { %1368 = vmatpush1.bf16.msra.mxu0 %v1367_v62  ;;  %v2815_v62 = vld [vmem:[#allocation106_spill] sm:$0xff] }
 0x295   : > { %1370 = vmatprep.subr.bf16.mxu0 %v1369_v34  ;;  %v1377_v52 = vpack.c.bf16 %v2816_v53, %v2815_v62  ;;  %1432 = vmatpush1.bf16.msra.mxu1 %v1431_v17  ;;  %v2817_v34 = vld [vmem:[#allocation83_spill] sm:$0xff]  ;;  %v2827_v17 = vld [vmem:[#allocation108_spill] sm:$0xff]  ;;  %v2828_v53 = vld [vmem:[#allocation114_spill] sm:$0xff] }
 0x296   : > { %v1435_v16 = vpack.c.bf16 %v2818_v50, %v2817_v34  ;;  %1434 = vmatprep.subr.bf16.mxu1 %v1433_v59  ;;  %v1441_v34 = vpack.c.bf16 %v2828_v53, %v2827_v17  ;;  %v2829_v59 = vld [vmem:[#allocation117_spill] sm:$0xff]  ;;  %v2830_v50 = vld [vmem:[#allocation123_spill] sm:$0xff]  ;;  %v2840_v53 = vld [vmem:[#allocation148_spill] sm:$0xff] }
 0x297   : > { %v1383_v10 = vpack.c.bf16 %v2830_v50, %v2829_v59  ;;  %v2842_v50 = vld [vmem:[#allocation125_spill] sm:$0xff] }
 0x298   : > { %1372 = vmatpush1.bf16.msra.mxu0 %v1371_v56  ;;  %v2823_v56 = vld [vmem:[#allocation118_spill] sm:$0xff] }
 0x299   : > { %1374 = vmatprep.subr.bf16.mxu0 %v1373_v4  ;;  %v1381_v22 = vpack.c.bf16 %v2824_v60, %v2823_v56  ;;  %1436 = vmatpush1.bf16.msra.mxu1 %v1435_v16  ;;  %v2825_v4 = vld [vmem:[#allocation95_spill] sm:$0xff]  ;;  %v2835_v16 = vld [vmem:[#allocation120_spill] sm:$0xff]  ;;  %v2836_v60 = vld [vmem:[#allocation126_spill] sm:$0xff] }
 0x29a   : > { %v1439_v62 = vpack.c.bf16 %v2826_v47, %v2825_v4  ;;  %1438 = vmatprep.subr.bf16.mxu1 %v1437_v46  ;;  %v1445_v4 = vpack.c.bf16 %v2836_v60, %v2835_v16  ;;  %v2837_v46 = vld [vmem:[#allocation129_spill] sm:$0xff]  ;;  %v2838_v47 = vld [vmem:[#allocation135_spill] sm:$0xff]  ;;  %v2848_v60 = vld [vmem:[#allocation160_spill] sm:$0xff] }
 0x29b   : > { %v1387_v17 = vpack.c.bf16 %v2838_v47, %v2837_v46  ;;  %v2850_v47 = vld [vmem:[#allocation137_spill] sm:$0xff] }
 0x29c   : > { %1376 = vmatpush1.bf16.msra.mxu0 %v1375_v63  ;;  %v2831_v63 = vld [vmem:[#allocation130_spill] sm:$0xff] }
 0x29d   : > { %1378 = vmatprep.subr.bf16.mxu0 %v1377_v52  ;;  %v1385_v11 = vpack.c.bf16 %v2832_v58, %v2831_v63  ;;  %1440 = vmatpush1.bf16.msra.mxu1 %v1439_v62  ;;  %v2833_v52 = vld [vmem:[#allocation107_spill] sm:$0xff]  ;;  %v2843_v62 = vld [vmem:[#allocation132_spill] sm:$0xff]  ;;  %v2844_v58 = vld [vmem:[#allocation138_spill] sm:$0xff] }
 0x29e   : > { %v1443_v56 = vpack.c.bf16 %v2834_v23, %v2833_v52  ;;  %1442 = vmatprep.subr.bf16.mxu1 %v1441_v34  ;;  %v1449_v52 = vpack.c.bf16 %v2844_v58, %v2843_v62  ;;  %v2845_v34 = vld [vmem:[#allocation141_spill] sm:$0xff]  ;;  %v2846_v23 = vld [vmem:[#allocation147_spill] sm:$0xff]  ;;  %v2856_v58 = vld [vmem:[#allocation16_spill] sm:$0xff] }
 0x29f   : > { %v1391_v16 = vpack.c.bf16 %v2846_v23, %v2845_v34  ;;  %v2858_v23 = vld [vmem:[#allocation149_spill] sm:$0xff] }
 0x2a0   : > { %1380 = vmatpush1.bf16.msra.mxu0 %v1379_v29  ;;  %v2839_v29 = vld [vmem:[#allocation142_spill] sm:$0xff] }
 0x2a1   : > { %1382 = vmatprep.subr.bf16.mxu0 %v1381_v22  ;;  %v1389_v59 = vpack.c.bf16 %v2840_v53, %v2839_v29  ;;  %1444 = vmatpush1.bf16.msra.mxu1 %v1443_v56  ;;  %v2841_v22 = vld [vmem:[#allocation119_spill] sm:$0xff]  ;;  %v2851_v56 = vld [vmem:[#allocation144_spill] sm:$0xff]  ;;  %v2852_v53 = vld [vmem:[#allocation150_spill] sm:$0xff] }
 0x2a2   : > { %v1447_v63 = vpack.c.bf16 %v2842_v50, %v2841_v22  ;;  %1446 = vmatprep.subr.bf16.mxu1 %v1445_v4  ;;  %v1453_v22 = vpack.c.bf16 %v2852_v53, %v2851_v56  ;;  %v2853_v4 = vld [vmem:[#allocation153_spill] sm:$0xff]  ;;  %v2854_v50 = vld [vmem:[#allocation159_spill] sm:$0xff]  ;;  %v2864_v53 = vld [vmem:[#allocation20_spill] sm:$0xff] }
 0x2a3   : > { %v1395_v62 = vpack.c.bf16 %v2854_v50, %v2853_v4  ;;  %v2866_v50 = vld [vmem:[#allocation161_spill] sm:$0xff] }
 0x2a4   : > { %1384 = vmatpush1.bf16.msra.mxu0 %v1383_v10  ;;  %v2847_v10 = vld [vmem:[#allocation154_spill] sm:$0xff] }
 0x2a5   : > { %1386 = vmatprep.subr.bf16.mxu0 %v1385_v11  ;;  %v1393_v46 = vpack.c.bf16 %v2848_v60, %v2847_v10  ;;  %1448 = vmatpush1.bf16.msra.mxu1 %v1447_v63  ;;  %v2849_v11 = vld [vmem:[#allocation131_spill] sm:$0xff]  ;;  %v2859_v63 = vld [vmem:[#allocation156_spill] sm:$0xff]  ;;  %v2860_v60 = vld [vmem:[#allocation162_spill] sm:$0xff] }
 0x2a6   : > { %v1451_v29 = vpack.c.bf16 %v2850_v47, %v2849_v11  ;;  %1450 = vmatprep.subr.bf16.mxu1 %v1449_v52  ;;  %v1457_v11 = vpack.c.bf16 %v2860_v60, %v2859_v63  ;;  %v2861_v52 = vld [vmem:[#allocation13_spill] sm:$0xff]  ;;  %v2862_v47 = vld [vmem:[#allocation15_spill] sm:$0xff]  ;;  %v2873_v60 = vld [vmem:[#allocation26_spill] sm:$0xff] }
 0x2a7   : > { %v1463_v56 = vpack.c.bf16 %v2862_v47, %v2861_v52  ;;  %v2874_v52 = vld [vmem:[#allocation28_spill] sm:$0xff] }
 0x2a8   : > { %1388 = vmatpush1.bf16.msra.mxu0 %v1387_v17  ;;  %v2855_v17 = vld [vmem:[#allocation14_spill] sm:$0xff]  ;;  %v1473_v47 = vpack.c.bf16 %v2874_v52, %v2873_v60  ;;  %v2887_v52 = vld [vmem:[#allocation49_spill] sm:$0xff] }
 0x2a9   : > { %1390 = vmatprep.subr.bf16.mxu0 %v1389_v59  ;;  %v1461_v34 = vpack.c.bf16 %v2856_v58, %v2855_v17  ;;  %1452 = vmatpush1.bf16.msra.mxu1 %v1451_v29  ;;  %v2857_v59 = vld [vmem:[#allocation143_spill] sm:$0xff]  ;;  %v2867_v29 = vld [vmem:[#allocation17_spill] sm:$0xff] }
 0x2aa   : > { %v1455_v10 = vpack.c.bf16 %v2858_v23, %v2857_v59  ;;  %1454 = vmatprep.subr.bf16.mxu1 %v1453_v22  ;;  %v2868_v22 = vld [vmem:[#allocation19_spill] sm:$0xff]  ;;  %v2870_v59 = vld [vmem:[#allocation24_spill] sm:$0xff]  ;;  %v2871_v23 = vld [vmem:[#allocation21_spill] sm:$0xff] }
 0x2ab   : > { %v1467_v58 = vpack.c.bf16 %v2868_v22, %v2867_v29  ;;  %v2881_v22 = vld [vmem:[#allocation39_spill] sm:$0xff] }
 0x2ac   : > { %1392 = vmatpush1.bf16.msra.mxu0 %v1391_v16  ;;  %v2863_v16 = vld [vmem:[#allocation18_spill] sm:$0xff] }
 0x2ad   : > { %1394 = vmatprep.subr.bf16.mxu0 %v1393_v46  ;;  %v1465_v4 = vpack.c.bf16 %v2864_v53, %v2863_v16  ;;  %1456 = vmatpush1.bf16.msra.mxu1 %v1455_v10  ;;  %v2865_v46 = vld [vmem:[#allocation155_spill] sm:$0xff] }
 0x2ae   : > { %v1459_v17 = vpack.c.bf16 %v2866_v50, %v2865_v46  ;;  %1458 = vmatprep.subr.bf16.mxu1 %v1457_v11  ;;  %v2872_v10 = vld [vmem:[#allocation23_spill] sm:$0xff]  ;;  %v2875_v11 = vld [vmem:[#allocation25_spill] sm:$0xff]  ;;  %v2879_v50 = vld [vmem:[#allocation30_spill] sm:$0xff] }
 0x2af   : > { %v1471_v63 = vpack.c.bf16 %v2872_v10, %v2871_v23  ;;  %v2877_v53 = vld [vmem:[#allocation31_spill] sm:$0xff]  ;;  %v2885_v10 = vld [vmem:[#allocation50_spill] sm:$0xff] }
 0x2b0   : > { %1396 = vmatpush1.bf16.msra.mxu0 %v1395_v62  ;;  %v2869_v62 = vld [vmem:[#allocation22_spill] sm:$0xff] }
 0x2b1   : > { %1462 = vmatprep.subr.bf16.mxu0 %v1461_v34  ;;  %v1469_v34 = vpack.c.bf16 %v2870_v59, %v2869_v62  ;;  %1460 = vmatpush1.bf16.msra.mxu1 %v1459_v17  ;;  %v2880_v17 = vld [vmem:[#allocation33_spill] sm:$0xff]  ;;  %v2883_v59 = vld [vmem:[#allocation38_spill] sm:$0xff] }
 0x2b2   : > { %v1479_v29 = vpack.c.bf16 %v2880_v17, %v2879_v50  ;;  %v2893_v17 = vld [vmem:[#allocation74_spill] sm:$0xff] }
 0x2b3   : > { %1005 = vmatmul.mubr.f32.vlgmr.msra.gmra.mrb[0].mxu0 %v1670_v5 }
 0x2b4   : > { %1464 = vmatpush1.bf16.msra.mxu0 %v1463_v56  ;;  %1146 = vmatprep.mubr.f32.mxu0 %v1666_v28  ;;  %v2876_v56 = vld [vmem:[#allocation27_spill] sm:$0xff] }
 0x2b5   : > { %1466 = vmatprep.subr.bf16.mxu0 %v1465_v4  ;;  %1076 = vmatmul.mubr.f32.vlgmr.msra.gmra.mrb[0].mxu1 %v1670_v5  ;;  %v1475_v16 = vpack.c.bf16 %v2876_v56, %v2875_v11  ;;  %v2878_v4 = vld [vmem:[#allocation34_spill] sm:$0xff] }
 0x2b6   : > { %v1477_v46 = vpack.c.bf16 %v2878_v4, %v2877_v53  ;;  %v2889_v56 = vld [vmem:[#allocation62_spill] sm:$0xff]  ;;  %v2891_v4 = vld [vmem:[#allocation61_spill] sm:$0xff] }
 0x2b8   : > { %1468 = vmatpush1.bf16.msra.mxu0 %v1467_v58  ;;  %v2882_v58 = vld [vmem:[#allocation44_spill] sm:$0xff] }
 0x2b9   : > { %1470 = vmatprep.subr.bf16.mxu0 %v1469_v34  ;;  %v1481_v62 = vpack.c.bf16 %v2882_v58, %v2881_v22  ;;  %v2884_v34 = vld [vmem:[#allocation43_spill] sm:$0xff]  ;;  %v2895_v58 = vld [vmem:[#allocation73_spill] sm:$0xff] }
 0x2ba   : > { %v1483_v23 = vpack.c.bf16 %v2884_v34, %v2883_v59  ;;  %v2897_v34 = vld [vmem:[#allocation86_spill] sm:$0xff] }
 0x2bc   : > { %1472 = vmatpush1.bf16.msra.mxu0 %v1471_v63  ;;  %v2886_v63 = vld [vmem:[#allocation56_spill] sm:$0xff] }
 0x2bd   : > { %1474 = vmatprep.subr.bf16.mxu0 %v1473_v47  ;;  %v1485_v60 = vpack.c.bf16 %v2886_v63, %v2885_v10  ;;  %v2888_v47 = vld [vmem:[#allocation55_spill] sm:$0xff]  ;;  %v2899_v63 = vld [vmem:[#allocation85_spill] sm:$0xff] }
 0x2be   : > { %v1487_v11 = vpack.c.bf16 %v2888_v47, %v2887_v52  ;;  %v2901_v47 = vld [vmem:[#allocation98_spill] sm:$0xff] }
 0x2c0   : > { %1476 = vmatpush1.bf16.msra.mxu0 %v1475_v16  ;;  %v2890_v16 = vld [vmem:[#allocation68_spill] sm:$0xff] }
 0x2c1   : > { %1478 = vmatprep.subr.bf16.mxu0 %v1477_v46  ;;  %v1489_v53 = vpack.c.bf16 %v2890_v16, %v2889_v56  ;;  %v2892_v46 = vld [vmem:[#allocation67_spill] sm:$0xff]  ;;  %v2903_v16 = vld [vmem:[#allocation97_spill] sm:$0xff] }
 0x2c2   : > { %v1491_v50 = vpack.c.bf16 %v2892_v46, %v2891_v4  ;;  %v2905_v46 = vld [vmem:[#allocation110_spill] sm:$0xff] }
 0x2c4   : > { %1480 = vmatpush1.bf16.msra.mxu0 %v1479_v29  ;;  %v2894_v29 = vld [vmem:[#allocation80_spill] sm:$0xff] }
 0x2c5   : > { %1482 = vmatprep.subr.bf16.mxu0 %v1481_v62  ;;  %v1493_v22 = vpack.c.bf16 %v2894_v29, %v2893_v17  ;;  %v2896_v62 = vld [vmem:[#allocation79_spill] sm:$0xff]  ;;  %v2907_v29 = vld [vmem:[#allocation109_spill] sm:$0xff] }
 0x2c6   : > { %v1495_v59 = vpack.c.bf16 %v2896_v62, %v2895_v58  ;;  %v2909_v62 = vld [vmem:[#allocation122_spill] sm:$0xff] }
 0x2c8   : > { %1484 = vmatpush1.bf16.msra.mxu0 %v1483_v23  ;;  %v2898_v23 = vld [vmem:[#allocation92_spill] sm:$0xff] }
 0x2c9   : > { %1486 = vmatprep.subr.bf16.mxu0 %v1485_v60  ;;  %v1497_v10 = vpack.c.bf16 %v2898_v23, %v2897_v34  ;;  %v2900_v60 = vld [vmem:[#allocation91_spill] sm:$0xff]  ;;  %v2911_v23 = vld [vmem:[#allocation121_spill] sm:$0xff] }
 0x2ca   : > { %v1499_v52 = vpack.c.bf16 %v2900_v60, %v2899_v63  ;;  %v2913_v60 = vld [vmem:[#allocation134_spill] sm:$0xff] }
 0x2cc   : > { %1488 = vmatpush1.bf16.msra.mxu0 %v1487_v11  ;;  %v2902_v11 = vld [vmem:[#allocation104_spill] sm:$0xff] }
 0x2cd   : > { %1490 = vmatprep.subr.bf16.mxu0 %v1489_v53  ;;  %v1501_v56 = vpack.c.bf16 %v2902_v11, %v2901_v47  ;;  %v2904_v53 = vld [vmem:[#allocation103_spill] sm:$0xff]  ;;  %v2915_v11 = vld [vmem:[#allocation133_spill] sm:$0xff] }
 0x2ce   : > { %v1503_v4 = vpack.c.bf16 %v2904_v53, %v2903_v16  ;;  %v2917_v53 = vld [vmem:[#allocation146_spill] sm:$0xff] }
 0x2d0   : > { %1492 = vmatpush1.bf16.msra.mxu0 %v1491_v50  ;;  %v2906_v50 = vld [vmem:[#allocation116_spill] sm:$0xff] }
 0x2d1   : > { %1494 = vmatprep.subr.bf16.mxu0 %v1493_v22  ;;  %v1505_v17 = vpack.c.bf16 %v2906_v50, %v2905_v46  ;;  %v2908_v22 = vld [vmem:[#allocation115_spill] sm:$0xff]  ;;  %v2919_v50 = vld [vmem:[#allocation145_spill] sm:$0xff] }
 0x2d2   : > { %v1507_v58 = vpack.c.bf16 %v2908_v22, %v2907_v29  ;;  %v2921_v22 = vld [vmem:[#allocation158_spill] sm:$0xff] }
 0x2d4   : > { %1496 = vmatpush1.bf16.msra.mxu0 %v1495_v59  ;;  %v2910_v59 = vld [vmem:[#allocation128_spill] sm:$0xff] }
 0x2d5   : > { %1498 = vmatprep.subr.bf16.mxu0 %v1497_v10  ;;  %v1509_v34 = vpack.c.bf16 %v2910_v59, %v2909_v62  ;;  %v2912_v10 = vld [vmem:[#allocation127_spill] sm:$0xff]  ;;  %v2923_v59 = vld [vmem:[#allocation157_spill] sm:$0xff] }
 0x2d6   : > { %v1511_v63 = vpack.c.bf16 %v2912_v10, %v2911_v23 }
 0x2d8   : > { %1500 = vmatpush1.bf16.msra.mxu0 %v1499_v52  ;;  %v2914_v52 = vld [vmem:[#allocation140_spill] sm:$0xff] }
 0x2d9   : > { %1502 = vmatprep.subr.bf16.mxu0 %v1501_v56  ;;  %v1513_v47 = vpack.c.bf16 %v2914_v52, %v2913_v60  ;;  %v2916_v56 = vld [vmem:[#allocation139_spill] sm:$0xff] }
 0x2da   : > { %v1515_v16 = vpack.c.bf16 %v2916_v56, %v2915_v11  ;;  %v2927_v56 = vsub.s32 1, %v2248_v35 }
 0x2dc   : > { %1504 = vmatpush1.bf16.msra.mxu0 %v1503_v4  ;;  %v2918_v4 = vld [vmem:[#allocation152_spill] sm:$0xff] }
 0x2dd   : > { %1506 = vmatprep.subr.bf16.mxu0 %v1505_v17  ;;  %v1517_v46 = vpack.c.bf16 %v2918_v4, %v2917_v53  ;;  %v2920_v17 = vld [vmem:[#allocation151_spill] sm:$0xff]  ;;  %v903_v4 = vld [vmem:[%s2559_s29] sm:$0xff] }
 0x2de   : > { %v1519_v29 = vpack.c.bf16 %v2920_v17, %v2919_v50  ;;  %v904_v50 = vld [vmem:[%s2559_s29 + $0x8] sm:$0xff] }
 0x2e0   : > { %1508 = vmatpush1.bf16.msra.mxu0 %v1507_v58  ;;  %v2922_v58 = vld [vmem:[#allocation164_spill] sm:$0xff] }
 0x2e1   : > { %1510 = vmatprep.subr.bf16.mxu0 %v1509_v34  ;;  %v1521_v62 = vpack.c.bf16 %v2922_v58, %v2921_v22  ;;  %v2924_v34 = vld [vmem:[#allocation163_spill] sm:$0xff]  ;;  %v2928_v22 = vsub.s32 2, %v2248_v35 }
 0x2e2   : > { %v1523_v23 = vpack.c.bf16 %v2924_v34, %v2923_v59 }
 0x2e4   : > { %1512 = vmatpush1.bf16.msra.mxu0 %v1511_v63 }
 0x2e5   : > { %1514 = vmatprep.subr.bf16.mxu0 %v1513_v47  ;;  %v2926_v47 = vld [vmem:[#allocation165_spill] sm:$0xff] }
 0x2e6   : > { %v913_v11 = vrot.slane %v2926_v47, %v2925_v41  ;;  %v921_v58 = vrot.slane %v2926_v47, %v2928_v22  ;;  %v906_v41 = vld [vmem:[%s2559_s29 + $0x18] sm:$0xff] }
 0x2e8   : > { %1516 = vmatpush1.bf16.msra.mxu0 %v1515_v16  ;;  %v917_v16 = vrot.slane %v2926_v47, %v2927_v56 }
 0x2e9   : > { %1518 = vmatprep.subr.bf16.mxu0 %v1517_v46 }
 0x2ec   : > { %1520 = vmatpush1.bf16.msra.mxu0 %v1519_v29 }
 0x2ed   : > { %1522 = vmatprep.subr.bf16.mxu0 %v1521_v62  ;;  %v2929_v62 = vsub.s32 3, %v2248_v35 }
 0x2ef   : > { %v925_v59 = vrot.slane %v2926_v47, %v2929_v62  ;;  %v2931_v62 = vsub.s32 5, %v2248_v35 }
 0x2f0   : > { %1524 = vmatpush1.bf16.msra.mxu0 %v1523_v23 }
 0x2f3   : > { %1147 = vmatmul.mubr.f32.vlgmr.msra.gmra.mrb[2].mxu0 %v1670_v5 }
 0x386   : > { %v1006_v10 = vpop.f32.mrb[0].mxu0 }
 0x387   : > { %v1008_v63 = vpop.f32.mrb[1].mxu0  ;;  %v1007_v53 = vadd.f32 %v1006_v10, %v913_v11  ;;  %v905_v11 = vld [vmem:[%s2559_s29 + $0x10] sm:$0xff] }
 0x388   : > { %v1077_v60 = vpop.f32.mrb[0].mxu1  ;;  %v1009_v46 = vadd.f32 %v1008_v63, %v917_v16 }
 0x389   : > { %v1079_v52 = vpop.f32.mrb[1].mxu1  ;;  %v1153_v17 = vadd.f32 %v1007_v53, %v903_v4  ;;  %v1078_v10 = vadd.f32 %v1077_v60, %v921_v58 }
 0x38a   : > { %v1154_v29 = vadd.f32 %v1009_v46, %v904_v50  ;;  %v1080_v56 = vadd.f32 %v1079_v52, %v925_v59  ;;  %v933_v59 = vrot.slane %v2926_v47, %v2931_v62 }
 0x38b   : > { %v1262_v34 = vmul.f32 -1.442695, %v1153_v17  ;;  %v1167_v63 = vadd.f32 %v1078_v10, %v905_v11 }
 0x38c   : > { %v1263_v23 = vmul.f32 -1.442695, %v1154_v29  ;;  %v1168_v16 = vadd.f32 %v1080_v56, %v906_v41  ;;  %v2930_v29 = vsub.s32 4, %v2248_v35 }
 0x38d   : > { %1560 = vpow2.f32 %v1262_v34  ;;  %v1264_v53 = vmul.f32 -1.442695, %v1167_v63 }
 0x38e   : > { %1562 = vpow2.f32 %v1263_v23  ;;  %v1265_v4 = vmul.f32 -1.442695, %v1168_v16  ;;  %v929_v58 = vrot.slane %v2926_v47, %v2930_v29 }
 0x38f   : > { %1564 = vpow2.f32 %v1264_v53  ;;  %v908_v53 = vld [vmem:[%s2559_s29 + $0x28] sm:$0xff] }
 0x390   : > { %1566 = vpow2.f32 %v1265_v4 }
 0x397   : > { %v1561_v46 = vpop.eup %1560 }
 0x398   : > { %v1563_v50 = vpop.eup %1562  ;;  %v1161_v22 = vadd.f32 1.0, %v1561_v46 }
 0x399   : > { %v1162_v0 = vadd.f32 1.0, %v1563_v50  ;;  %v1565_v17 = vpop.eup %1564 }
 0x39a   : > { %1568 = vrcp.f32 %v1161_v22  ;;  %v1567_v60 = vpop.eup %1566  ;;  %v1175_v52 = vadd.f32 1.0, %v1565_v17 }
 0x39b   : > { %1570 = vrcp.f32 %v1162_v0  ;;  %v1176_v41 = vadd.f32 1.0, %v1567_v60  ;;  %v907_v0 = vld [vmem:[%s2559_s29 + $0x20] sm:$0xff] }
 0x39c   : > { %1572 = vrcp.f32 %v1175_v52 }
 0x39d   : > { %1574 = vrcp.f32 %v1176_v41 }
 0x3a4   : > { %v1569_v11 = vpop.eup %1568 }
 0x3a5   : > { %v1571_v63 = vpop.eup %1570 }
 0x3a6   : > { %v1573_v22 = vpop.eup %1572 }
 0x3a7   : > { %v1575_v17 = vpop.eup %1574  ;;  %v1187_v60 = vsub.f32 1.0, %v1573_v22 }
 0x3a8   : > { %v1188_v29 = vsub.f32 1.0, %v1575_v17  ;;  %v1192_v41 = vmul.f32 %v1666_v28, %v1575_v17 }
 0x3c6   : > { %v1148_v34 = vpop.f32.mrb[2].mxu0 }
 0x3c7   : > { %v1149_v23 = vadd.f32 %v1148_v34, %v929_v58  ;;  %v1150_v10 = vpop.f32.mrb[3].mxu0  ;;  %v1191_v58 = vmul.f32 %v1670_v5, %v1573_v22 }
 0x3c8   : > { %v1151_v56 = vadd.f32 %v1150_v10, %v933_v59 }
 0x3c9   : > { %v1181_v16 = vmul.f32 %v1569_v11, %v1149_v23 }
 0x3ca   : > { %v1182_v4 = vmul.f32 %v1571_v63, %v1151_v56 }
 0x3cb   : > { %v1183_v46 = vadd.f32 %v1181_v16, %v907_v0 }
 0x3cc   : > { %v1184_v50 = vadd.f32 %v1182_v4, %v908_v53 }
 0x3cd   : > { %1576 = vtanh.f32 %v1183_v46 }
 0x3ce   : > { %1578 = vtanh.f32 %v1184_v50 }
 0x3d7   : > { %v1577_v62 = vpop.eup %1576  ;;  %894 = sbr.rel (!%p891_p2) target bundleno = 625 (0x271), region = 68 }
 0x3d8   : > { %v1579_v52 = vpop.eup %1578  ;;  %v1189_v34 = vmul.f32 %v1577_v62, %v1187_v60 }
 0x3d9   : > { %v1190_v59 = vmul.f32 %v1579_v52, %v1188_v29 }
 0x3da   : > { %v1193_v10 = vadd.f32 %v1191_v58, %v1189_v34  }
 0x3db   : > { %v1194_v23 = vadd.f32 %v1192_v41, %v1190_v59  }
 0x3dc   : > { %v2933_v5 = vmov %v1193_v10  ;;  %1195 = vst [vmem:[#allocation8] sm:$0xff] (%p891_p2), %v1193_v10 }
 0x3dd   : > { %v2932_v28 = vmov %v1194_v23  ;;  %1196 = vst [vmem:[#allocation8 + $0x8] sm:$0xff] (%p891_p2), %v1194_v23 }
 0x3de   :  { %1635 = shalt.err (!%p1632_p7)
}
 0x3df   :  { %s1636_s12 = scalar_lea.hbm %s2607_s7, 256 }
 0x3e0   :  { %p1637_p8 = scmp.ne.s32.totalorder %s2607_s7, %s1636_s12  ;;  %p1640_p9 = scmp.lt.u32.totalorder %s1636_s12, %s2607_s7 }
 0x3e2   :  { %p1642_p10 = pnand %p1640_p9, %p1637_p8 }
 0x3e4   :  { %1645 = shalt.err (!%p1642_p10)
}
 0x3e5   :  { %1206 = dma.vmem_to_hbm [thread:$0]  %s1204_s8, 256, %s2607_s7, [#allocation5]  }
 0x3e6   :  { %1662 = dma.done.wait [#allocation5], 256  }
 0x3e7   :  { %1663 = vsyncadd [#allocation5], 4294967040 }
 0x3e8   :  { %1210 = vsyncpa [#allocation4], 1 }
 0x3e9   :  { %1211 = vsyncpa [#allocation7], 1 }
 0x3ea   :  { %1212 = vsyncpa [#allocation5], 1 }

</bundles_post_ra>
